<compile_context>
chip_gen: v7x
topology: tpu7x:2x2x1
jax: 0.10.0
libtpu: 0.0.40
codegen_flags: <defaults>
</compile_context>

<pallas_src>
import functools

import jax
import jax.numpy as jnp
import numpy as np
from jax.experimental import pallas as pl
from jax.experimental.pallas import tpu as pltpu


# ----------------------------------------------------------------------------
# Config (small, consistent with the module's forward)
# ----------------------------------------------------------------------------
B = 8                 # batch
S = 8                 # sequence length
VOCAB = 64
H = 32                # bert hidden_size
N_BERT_LAYERS = 4
FEATURE_LAYERS = 2
FH = FEATURE_LAYERS * H          # 64 : concatenated CLS feature dim
N_GROUPS = 16                    # group_y.shape[0]
GROUP_SIZE = 8                   # uniform group size (no ragged padding)
N_LABELS = N_GROUPS * GROUP_SIZE # 128
HIDDEN_DIM = 64                  # meta-embedding dim (l1 / embed)
TOPK = 4                         # candidates_topk
N_CAND = TOPK * GROUP_SIZE       # 32 candidates per sample

# fused l0+l1 output width, padded to a full 128-lane vreg width
FUSED_OUT = 128
assert N_GROUPS + HIDDEN_DIM <= FUSED_OUT


# ----------------------------------------------------------------------------
# Single fused Pallas kernel: l0|l1 matmul -> top-k -> group_y gather ->
# candidate scoring, all in one grid step.
# ----------------------------------------------------------------------------
def _lightxml_fused_kernel(feat_ref, w01_ref, b01_ref, embed_t_ref, gy_ref,
                           glog_ref, cand_ref, score_ref):
    Bn = feat_ref.shape[0]

    # (1) fused l0|l1: one lane-dense bf16 MXU matmul, f32 accumulation.
    raw = jnp.dot(feat_ref[...], w01_ref[...],
                  preferred_element_type=jnp.float32) + b01_ref[...]     # (B,128)
    g = raw[:, :N_GROUPS]                                                # (B,16)
    emb = raw[:, N_GROUPS:N_GROUPS + HIDDEN_DIM]                         # (B,64)
    glog_ref[...] = g

    # (2) in-kernel top-TOPK over the group lanes.  sigmoid is monotone, so
    #     ranking the raw logits == ranking sigmoid(logits); sigmoid is only
    #     applied to the TOPK kept scores (EUP).
    lane_f = jax.lax.broadcasted_iota(
        jnp.int32, (Bn, N_GROUPS), 1).astype(jnp.float32)
    col_i = jax.lax.broadcasted_iota(jnp.int32, (Bn, N_CAND), 1)
    masked = g
    cand_grp_f = jnp.zeros((Bn, N_CAND), jnp.float32)  # top-k group id per cand col
    gcs = jnp.zeros((Bn, N_CAND), jnp.float32)         # sigmoid(group logit) per cand col
    for t in range(TOPK):                              # static, unrolled
        m = jnp.max(masked, axis=1, keepdims=True)                       # (B,1)
        idx_f = jnp.min(jnp.where(masked == m, lane_f, float(N_GROUPS)),
                        axis=1, keepdims=True)                           # (B,1) argmax (lowest idx)
        in_slot = jnp.logical_and(col_i >= t * GROUP_SIZE,
                                  col_i < (t + 1) * GROUP_SIZE)          # (B,C)
        gcs = jnp.where(in_slot, jax.nn.sigmoid(m), gcs)
        cand_grp_f = jnp.where(in_slot, idx_f, cand_grp_f)
        masked = jnp.where(lane_f == idx_f, -1e30, masked)               # drop found max

    # (3) group_y gather (supports a general group_y): gy_ref holds group_y
    #     tiled to (G, C) as f32 (label ids <= 127, exact).  One-hot over the
    #     16 groups + sublane reduce.
    g_iota_f = jax.lax.broadcasted_iota(
        jnp.int32, (1, N_GROUPS, 1), 1).astype(jnp.float32)
    onehot_g = cand_grp_f[:, None, :] == g_iota_f                        # (B,G,C)
    cand_f = jnp.sum(jnp.where(onehot_g, gy_ref[...][None, :, :], 0.0),
                     axis=1)                                             # (B,C) label ids
    cand_ref[...] = cand_f.astype(jnp.int32)

    # (4) all-label logits on the MXU: emb @ embed^T with the embed table
    #     stored pre-transposed (D, L) -> RHS lane dim is L (lane-dense).
    all_logits = jnp.dot(emb.astype(jnp.bfloat16), embed_t_ref[...],
                         preferred_element_type=jnp.float32)             # (B,L)

    # (5) candidate selection via lane mask + lane-reduce (where-select, iota
    #     built as a (1,1,L) broadcast -- no bool->f32 multiply).
    lbl_f = jax.lax.broadcasted_iota(
        jnp.int32, (1, 1, N_LABELS), 2).astype(jnp.float32)
    picked = jnp.where(cand_f[:, :, None] == lbl_f,
                       all_logits[:, None, :], 0.0)                      # (B,C,L)
    logits = jnp.sum(picked, axis=-1)                                    # (B,C)

    score_ref[...] = jax.nn.sigmoid(logits) * gcs


def lightxml_fused(feat_bf, w01, b01, embed_t, gy_tiled):
    Bn = feat_bf.shape[0]
    return pl.pallas_call(
        _lightxml_fused_kernel,
        out_shape=(jax.ShapeDtypeStruct((Bn, N_GROUPS), jnp.float32),
                   jax.ShapeDtypeStruct((Bn, N_CAND), jnp.int32),
                   jax.ShapeDtypeStruct((Bn, N_CAND), jnp.float32)),
        grid=(1,),
        in_specs=[
            pl.BlockSpec((Bn, FH), lambda i: (0, 0)),
            pl.BlockSpec((FH, FUSED_OUT), lambda i: (0, 0)),
            pl.BlockSpec((1, FUSED_OUT), lambda i: (0, 0)),
            pl.BlockSpec((HIDDEN_DIM, N_LABELS), lambda i: (0, 0)),
            pl.BlockSpec((N_GROUPS, N_CAND), lambda i: (0, 0)),
        ],
        out_specs=(pl.BlockSpec((Bn, N_GROUPS), lambda i: (0, 0)),
                   pl.BlockSpec((Bn, N_CAND), lambda i: (0, 0)),
                   pl.BlockSpec((Bn, N_CAND), lambda i: (0, 0))),
        compiler_params=pltpu.CompilerParams(
            dimension_semantics=("arbitrary",)),
    )(feat_bf, w01, b01, embed_t, gy_tiled)


# ----------------------------------------------------------------------------
# Parameter construction (deterministic, in-script)
# ----------------------------------------------------------------------------
def init_params(key):
    ks = jax.random.split(key, 8 + N_BERT_LAYERS)
    params = {}
    # tiny BERT stand-in
    params["tok_emb"] = 0.1 * jax.random.normal(ks[0], (VOCAB, H), jnp.float32)
    params["bert_layers"] = []
    for li in range(N_BERT_LAYERS):
        wl = 0.2 * jax.random.normal(ks[1 + li], (H, H), jnp.float32)
        bl = jnp.zeros((H,), jnp.float32)
        params["bert_layers"].append((wl, bl))
    k = 1 + N_BERT_LAYERS
    # l0: Linear(FH -> N_GROUPS) stored (in, out); weights in bf16 (MXU-native)
    params["w0"] = (0.1 * jax.random.normal(ks[k], (FH, N_GROUPS),
                                            jnp.float32)).astype(jnp.bfloat16)
    params["b0"] = 0.01 * jax.random.normal(ks[k + 1], (N_GROUPS,), jnp.float32)
    # l1: Linear(FH -> HIDDEN_DIM)
    params["w1"] = (0.1 * jax.random.normal(ks[k + 2], (FH, HIDDEN_DIM),
                                            jnp.float32)).astype(jnp.bfloat16)
    params["b1"] = 0.01 * jax.random.normal(ks[k + 3], (HIDDEN_DIM,), jnp.float32)
    # label embedding (xavier_uniform-style scale), bf16 table
    limit = float(np.sqrt(6.0 / (N_LABELS + HIDDEN_DIM)))
    params["embed"] = jax.random.uniform(
        ks[k + 4], (N_LABELS, HIDDEN_DIM), jnp.float32,
        -limit, limit).astype(jnp.bfloat16)                      # (L, D) bf16
    params["embed_t"] = jnp.transpose(params["embed"])           # (D, L) bf16, lane-dense RHS
    # group_y: uniform partition of the label space
    params["group_y"] = jnp.arange(N_LABELS, dtype=jnp.int32).reshape(
        N_GROUPS, GROUP_SIZE)
    # group_y tiled to (G, C) f32 for the in-kernel one-hot gather
    params["gy_tiled"] = jnp.tile(params["group_y"],
                                  (1, TOPK)).astype(jnp.float32)

    # fused + lane-padded l0/l1 weights for the kernel (done once, at init)
    w01 = jnp.concatenate([params["w0"], params["w1"]], axis=1)  # (FH, 80) bf16
    b01 = jnp.concatenate([params["b0"], params["b1"]])          # (80,) f32
    pad = FUSED_OUT - w01.shape[1]
    params["w01"] = jnp.pad(w01, ((0, 0), (0, pad)))             # (FH, 128) bf16
    params["b01"] = jnp.pad(b01, (0, pad)).reshape(1, FUSED_OUT) # (1, 128) f32
    return params


def tiny_bert(input_ids, params):
    """Deterministic stand-in for the injected bert(input_ids, output_layers=True)."""
    x = params["tok_emb"][input_ids]                     # (B, S, H)
    outs = []
    for wl, bl in params["bert_layers"]:
        x = jnp.tanh(x @ wl + bl)
        outs.append(x)
    return outs                                          # list of (B, S, H)


# ----------------------------------------------------------------------------
# Full LightXML forward (inference, group_y path)
# ----------------------------------------------------------------------------
@functools.partial(jax.jit, static_argnums=())
def lightxml_forward(input_ids, params):
    outs = tiny_bert(input_ids, params)
    # out = cat([outs[-i][:, 0] for i in 1..feature_layers], dim=-1)
    feat = jnp.concatenate(
        [outs[-i][:, 0] for i in range(1, FEATURE_LAYERS + 1)], axis=-1)
    # dropout is identity at inference
    feat_bf = feat.astype(jnp.bfloat16)                  # halves input DMA bytes

    group_logits, candidates, cand_scores = lightxml_fused(
        feat_bf, params["w01"], params["b01"],
        params["embed_t"], params["gy_tiled"])
    return group_logits, candidates, cand_scores


def reference_forward(input_ids, params):
    """Pure-JAX reference (same bf16 weight/activation casts as the kernel)."""
    outs = tiny_bert(input_ids, params)
    feat = jnp.concatenate(
        [outs[-i][:, 0] for i in range(1, FEATURE_LAYERS + 1)], axis=-1)
    feat_bf = feat.astype(jnp.bfloat16)
    group_logits = jnp.dot(feat_bf, params["w0"],
                           preferred_element_type=jnp.float32) + params["b0"]
    emb = jnp.dot(feat_bf, params["w1"],
                  preferred_element_type=jnp.float32) + params["b1"]
    probs = jax.nn.sigmoid(group_logits)
    scores, indices = jax.lax.top_k(probs, TOPK)
    candidates = params["group_y"][indices].reshape(B, N_CAND)
    gcs = jnp.repeat(scores, GROUP_SIZE, axis=1)
    embed_w = jnp.take(params["embed"], candidates, axis=0)       # (B,C,D) bf16
    logits = jnp.einsum("bcd,bd->bc", embed_w, emb.astype(jnp.bfloat16),
                        preferred_element_type=jnp.float32)
    return group_logits, candidates, jax.nn.sigmoid(logits) * gcs


if __name__ == "__main__":
    key = jax.random.PRNGKey(0)
    pkey, dkey = jax.random.split(key)
    params = init_params(pkey)
    input_ids = jax.random.randint(dkey, (B, S), 0, VOCAB, dtype=jnp.int32)

    group_logits, candidates, cand_scores = lightxml_forward(input_ids, params)
    jax.block_until_ready((group_logits, candidates, cand_scores))

    rg, rc, rs = reference_forward(input_ids, params)
    assert group_logits.shape == (B, N_GROUPS)
    assert candidates.shape == (B, N_CAND) and candidates.dtype == jnp.int32
    assert cand_scores.shape == (B, N_CAND)
    np.testing.assert_allclose(np.asarray(group_logits), np.asarray(rg),
                               rtol=1e-2, atol=1e-2)
    np.testing.assert_array_equal(np.asarray(candidates), np.asarray(rc))
    np.testing.assert_allclose(np.asarray(cand_scores), np.asarray(rs),
                               rtol=1e-2, atol=1e-2)
    print("KERNEL_OK")
</pallas_src>

<mosaic_0001>
module attributes {stable_mosaic.version = 11 : i64} {
  func.func @_lightxml_fused_kernel(%arg0: i32, %arg1: memref<8x64xbf16, #tpu.memory_space<vmem>>, %arg2: memref<64x128xbf16, #tpu.memory_space<vmem>>, %arg3: memref<1x128xf32, #tpu.memory_space<vmem>>, %arg4: memref<64x128xbf16, #tpu.memory_space<vmem>>, %arg5: memref<16x32xf32, #tpu.memory_space<vmem>>, %arg6: memref<8x16xf32, #tpu.memory_space<vmem>>, %arg7: memref<8x32xi32, #tpu.memory_space<vmem>>, %arg8: memref<8x32xf32, #tpu.memory_space<vmem>>) attributes {dimension_semantics = [#tpu.dimension_semantics<arbitrary>], iteration_bounds = array<i64: 1>, scalar_prefetch = 0 : i64, scratch_operands = 0 : i64, tpu.core_type = #tpu.core_type<tc>, window_params = [{pipeline_mode = #tpu.pipeline_mode<synchronous>, transform_indices = @transform_0, window_bounds = array<i64: 8, 64>}, {pipeline_mode = #tpu.pipeline_mode<synchronous>, transform_indices = @transform_1, window_bounds = array<i64: 64, 128>}, {pipeline_mode = #tpu.pipeline_mode<synchronous>, transform_indices = @transform_2, window_bounds = array<i64: 1, 128>}, {pipeline_mode = #tpu.pipeline_mode<synchronous>, transform_indices = @transform_3, window_bounds = array<i64: 64, 128>}, {pipeline_mode = #tpu.pipeline_mode<synchronous>, transform_indices = @transform_4, window_bounds = array<i64: 16, 32>}, {pipeline_mode = #tpu.pipeline_mode<synchronous>, transform_indices = @transform_5, window_bounds = array<i64: 8, 16>}, {pipeline_mode = #tpu.pipeline_mode<synchronous>, transform_indices = @transform_6, window_bounds = array<i64: 8, 32>}, {pipeline_mode = #tpu.pipeline_mode<synchronous>, transform_indices = @transform_7, window_bounds = array<i64: 8, 32>}]} {
    %c0 = arith.constant 0 : index
    %c0_0 = arith.constant 0 : index
    %0 = vector.load %arg1[%c0, %c0_0] : memref<8x64xbf16, #tpu.memory_space<vmem>>, vector<8x64xbf16>
    %c0_1 = arith.constant 0 : index
    %c0_2 = arith.constant 0 : index
    %1 = vector.load %arg2[%c0_1, %c0_2] : memref<64x128xbf16, #tpu.memory_space<vmem>>, vector<64x128xbf16>
    %cst = arith.constant dense<0.000000e+00> : vector<8x128xf32>
    %2 = tpu.matmul %0, %1, %cst {dimension_numbers = #tpu.dot_dimension_numbers<[1], [0], [0], [1], [0, 0, 1, 1], [], []>} : vector<8x64xbf16>, vector<64x128xbf16>, vector<8x128xf32> -> vector<8x128xf32>
    %c0_3 = arith.constant 0 : index
    %c0_4 = arith.constant 0 : index
    %3 = vector.load %arg3[%c0_3, %c0_4] : memref<1x128xf32, #tpu.memory_space<vmem>>, vector<1x128xf32>
    %4 = vector.broadcast %3 : vector<1x128xf32> to vector<8x128xf32>
    %5 = arith.addf %2, %4 : vector<8x128xf32>
    %6 = vector.extract_strided_slice %5 {offsets = [0, 0], sizes = [8, 16], strides = [1, 1]} : vector<8x128xf32> to vector<8x16xf32>
    %7 = vector.extract_strided_slice %5 {offsets = [0, 16], sizes = [8, 64], strides = [1, 1]} : vector<8x128xf32> to vector<8x64xf32>
    %c0_5 = arith.constant 0 : index
    %c0_6 = arith.constant 0 : index
    %8 = vector.load %arg6[%c0_5, %c0_6] : memref<8x16xf32, #tpu.memory_space<vmem>>, vector<8x16xf32>
    tpu.vector_store %arg6[%c0_5, %c0_6], %6 {strides = array<i32>} : memref<8x16xf32, #tpu.memory_space<vmem>>, vector<8x16xf32>,
    %9 = tpu.iota {dimensions = array<i32: 1>} : vector<8x16xi32>
    %10 = arith.sitofp %9 : vector<8x16xi32> to vector<8x16xf32>
    %11 = tpu.iota {dimensions = array<i32: 1>} : vector<8x32xi32>
    %cst_7 = arith.constant 0.000000e+00 : f32
    %12 = vector.broadcast %cst_7 : f32 to vector<8x32xf32>
    %cst_8 = arith.constant 0.000000e+00 : f32
    %13 = vector.broadcast %cst_8 : f32 to vector<8x32xf32>
    %cst_9 = arith.constant dense<0xFF800000> : vector<8xf32>
    %14 = vector.multi_reduction <maximumf>, %6, %cst_9 [1] : vector<8x16xf32> to vector<8xf32>
    %15 = vector.shape_cast %14 : vector<8xf32> to vector<8x1xf32>
    %16 = vector.broadcast %15 : vector<8x1xf32> to vector<8x16xf32>
    %17 = arith.cmpf oeq, %6, %16 : vector<8x16xf32>
    %cst_10 = arith.constant 1.600000e+01 : f32
    %18 = vector.broadcast %cst_10 : f32 to vector<8x16xf32>
    %19 = arith.select %17, %10, %18 : vector<8x16xi1>, vector<8x16xf32>
    %cst_11 = arith.constant dense<0x7F800000> : vector<8xf32>
    %20 = vector.multi_reduction <minimumf>, %19, %cst_11 [1] : vector<8x16xf32> to vector<8xf32>
    %21 = vector.shape_cast %20 : vector<8xf32> to vector<8x1xf32>
    %c0_i32 = arith.constant 0 : i32
    %22 = vector.broadcast %c0_i32 : i32 to vector<8x32xi32>
    %23 = arith.cmpi sge, %11, %22 : vector<8x32xi32>
    %c8_i32 = arith.constant 8 : i32
    %24 = vector.broadcast %c8_i32 : i32 to vector<8x32xi32>
    %25 = arith.cmpi slt, %11, %24 : vector<8x32xi32>
    %26 = arith.andi %23, %25 : vector<8x32xi1>
    %27 = arith.negf %15 : vector<8x1xf32>
    %28 = math.exp %27 : vector<8x1xf32>
    %cst_12 = arith.constant 1.000000e+00 : f32
    %29 = vector.broadcast %cst_12 : f32 to vector<8x1xf32>
    %30 = arith.addf %29, %28 : vector<8x1xf32>
    %31 = arith.divf %29, %30 : vector<8x1xf32>
    %32 = vector.shape_cast %31 : vector<8x1xf32> to vector<8x1xf32>
    %33 = vector.broadcast %32 : vector<8x1xf32> to vector<8x32xf32>
    %34 = arith.select %26, %33, %13 : vector<8x32xi1>, vector<8x32xf32>
    %35 = vector.shape_cast %21 : vector<8x1xf32> to vector<8x1xf32>
    %36 = vector.broadcast %35 : vector<8x1xf32> to vector<8x32xf32>
    %37 = arith.select %26, %36, %12 : vector<8x32xi1>, vector<8x32xf32>
    %38 = vector.broadcast %21 : vector<8x1xf32> to vector<8x16xf32>
    %39 = arith.cmpf oeq, %10, %38 : vector<8x16xf32>
    %cst_13 = arith.constant -1.000000e+30 : f32
    %40 = vector.broadcast %cst_13 : f32 to vector<8x16xf32>
    %41 = arith.select %39, %40, %6 : vector<8x16xi1>, vector<8x16xf32>
    %cst_14 = arith.constant dense<0xFF800000> : vector<8xf32>
    %42 = vector.multi_reduction <maximumf>, %41, %cst_14 [1] : vector<8x16xf32> to vector<8xf32>
    %43 = vector.shape_cast %42 : vector<8xf32> to vector<8x1xf32>
    %44 = vector.broadcast %43 : vector<8x1xf32> to vector<8x16xf32>
    %45 = arith.cmpf oeq, %41, %44 : vector<8x16xf32>
    %cst_15 = arith.constant 1.600000e+01 : f32
    %46 = vector.broadcast %cst_15 : f32 to vector<8x16xf32>
    %47 = arith.select %45, %10, %46 : vector<8x16xi1>, vector<8x16xf32>
    %cst_16 = arith.constant dense<0x7F800000> : vector<8xf32>
    %48 = vector.multi_reduction <minimumf>, %47, %cst_16 [1] : vector<8x16xf32> to vector<8xf32>
    %49 = vector.shape_cast %48 : vector<8xf32> to vector<8x1xf32>
    %c8_i32_17 = arith.constant 8 : i32
    %50 = vector.broadcast %c8_i32_17 : i32 to vector<8x32xi32>
    %51 = arith.cmpi sge, %11, %50 : vector<8x32xi32>
    %c16_i32 = arith.constant 16 : i32
    %52 = vector.broadcast %c16_i32 : i32 to vector<8x32xi32>
    %53 = arith.cmpi slt, %11, %52 : vector<8x32xi32>
    %54 = arith.andi %51, %53 : vector<8x32xi1>
    %55 = arith.negf %43 : vector<8x1xf32>
    %56 = math.exp %55 : vector<8x1xf32>
    %cst_18 = arith.constant 1.000000e+00 : f32
    %57 = vector.broadcast %cst_18 : f32 to vector<8x1xf32>
    %58 = arith.addf %57, %56 : vector<8x1xf32>
    %59 = arith.divf %57, %58 : vector<8x1xf32>
    %60 = vector.shape_cast %59 : vector<8x1xf32> to vector<8x1xf32>
    %61 = vector.broadcast %60 : vector<8x1xf32> to vector<8x32xf32>
    %62 = arith.select %54, %61, %34 : vector<8x32xi1>, vector<8x32xf32>
    %63 = vector.shape_cast %49 : vector<8x1xf32> to vector<8x1xf32>
    %64 = vector.broadcast %63 : vector<8x1xf32> to vector<8x32xf32>
    %65 = arith.select %54, %64, %37 : vector<8x32xi1>, vector<8x32xf32>
    %66 = vector.broadcast %49 : vector<8x1xf32> to vector<8x16xf32>
    %67 = arith.cmpf oeq, %10, %66 : vector<8x16xf32>
    %cst_19 = arith.constant -1.000000e+30 : f32
    %68 = vector.broadcast %cst_19 : f32 to vector<8x16xf32>
    %69 = arith.select %67, %68, %41 : vector<8x16xi1>, vector<8x16xf32>
    %cst_20 = arith.constant dense<0xFF800000> : vector<8xf32>
    %70 = vector.multi_reduction <maximumf>, %69, %cst_20 [1] : vector<8x16xf32> to vector<8xf32>
    %71 = vector.shape_cast %70 : vector<8xf32> to vector<8x1xf32>
    %72 = vector.broadcast %71 : vector<8x1xf32> to vector<8x16xf32>
    %73 = arith.cmpf oeq, %69, %72 : vector<8x16xf32>
    %cst_21 = arith.constant 1.600000e+01 : f32
    %74 = vector.broadcast %cst_21 : f32 to vector<8x16xf32>
    %75 = arith.select %73, %10, %74 : vector<8x16xi1>, vector<8x16xf32>
    %cst_22 = arith.constant dense<0x7F800000> : vector<8xf32>
    %76 = vector.multi_reduction <minimumf>, %75, %cst_22 [1] : vector<8x16xf32> to vector<8xf32>
    %77 = vector.shape_cast %76 : vector<8xf32> to vector<8x1xf32>
    %c16_i32_23 = arith.constant 16 : i32
    %78 = vector.broadcast %c16_i32_23 : i32 to vector<8x32xi32>
    %79 = arith.cmpi sge, %11, %78 : vector<8x32xi32>
    %c24_i32 = arith.constant 24 : i32
    %80 = vector.broadcast %c24_i32 : i32 to vector<8x32xi32>
    %81 = arith.cmpi slt, %11, %80 : vector<8x32xi32>
    %82 = arith.andi %79, %81 : vector<8x32xi1>
    %83 = arith.negf %71 : vector<8x1xf32>
    %84 = math.exp %83 : vector<8x1xf32>
    %cst_24 = arith.constant 1.000000e+00 : f32
    %85 = vector.broadcast %cst_24 : f32 to vector<8x1xf32>
    %86 = arith.addf %85, %84 : vector<8x1xf32>
    %87 = arith.divf %85, %86 : vector<8x1xf32>
    %88 = vector.shape_cast %87 : vector<8x1xf32> to vector<8x1xf32>
    %89 = vector.broadcast %88 : vector<8x1xf32> to vector<8x32xf32>
    %90 = arith.select %82, %89, %62 : vector<8x32xi1>, vector<8x32xf32>
    %91 = vector.shape_cast %77 : vector<8x1xf32> to vector<8x1xf32>
    %92 = vector.broadcast %91 : vector<8x1xf32> to vector<8x32xf32>
    %93 = arith.select %82, %92, %65 : vector<8x32xi1>, vector<8x32xf32>
    %94 = vector.broadcast %77 : vector<8x1xf32> to vector<8x16xf32>
    %95 = arith.cmpf oeq, %10, %94 : vector<8x16xf32>
    %cst_25 = arith.constant -1.000000e+30 : f32
    %96 = vector.broadcast %cst_25 : f32 to vector<8x16xf32>
    %97 = arith.select %95, %96, %69 : vector<8x16xi1>, vector<8x16xf32>
    %cst_26 = arith.constant dense<0xFF800000> : vector<8xf32>
    %98 = vector.multi_reduction <maximumf>, %97, %cst_26 [1] : vector<8x16xf32> to vector<8xf32>
    %99 = vector.shape_cast %98 : vector<8xf32> to vector<8x1xf32>
    %100 = vector.broadcast %99 : vector<8x1xf32> to vector<8x16xf32>
    %101 = arith.cmpf oeq, %97, %100 : vector<8x16xf32>
    %cst_27 = arith.constant 1.600000e+01 : f32
    %102 = vector.broadcast %cst_27 : f32 to vector<8x16xf32>
    %103 = arith.select %101, %10, %102 : vector<8x16xi1>, vector<8x16xf32>
    %cst_28 = arith.constant dense<0x7F800000> : vector<8xf32>
    %104 = vector.multi_reduction <minimumf>, %103, %cst_28 [1] : vector<8x16xf32> to vector<8xf32>
    %105 = vector.shape_cast %104 : vector<8xf32> to vector<8x1xf32>
    %c24_i32_29 = arith.constant 24 : i32
    %106 = vector.broadcast %c24_i32_29 : i32 to vector<8x32xi32>
    %107 = arith.cmpi sge, %11, %106 : vector<8x32xi32>
    %c32_i32 = arith.constant 32 : i32
    %108 = vector.broadcast %c32_i32 : i32 to vector<8x32xi32>
    %109 = arith.cmpi slt, %11, %108 : vector<8x32xi32>
    %110 = arith.andi %107, %109 : vector<8x32xi1>
    %111 = arith.negf %99 : vector<8x1xf32>
    %112 = math.exp %111 : vector<8x1xf32>
    %cst_30 = arith.constant 1.000000e+00 : f32
    %113 = vector.broadcast %cst_30 : f32 to vector<8x1xf32>
    %114 = arith.addf %113, %112 : vector<8x1xf32>
    %115 = arith.divf %113, %114 : vector<8x1xf32>
    %116 = vector.shape_cast %115 : vector<8x1xf32> to vector<8x1xf32>
    %117 = vector.broadcast %116 : vector<8x1xf32> to vector<8x32xf32>
    %118 = arith.select %110, %117, %90 : vector<8x32xi1>, vector<8x32xf32>
    %119 = vector.shape_cast %105 : vector<8x1xf32> to vector<8x1xf32>
    %120 = vector.broadcast %119 : vector<8x1xf32> to vector<8x32xf32>
    %121 = arith.select %110, %120, %93 : vector<8x32xi1>, vector<8x32xf32>
    %122 = tpu.iota {dimensions = array<i32: 1>} : vector<1x16x1xi32>
    %123 = arith.sitofp %122 : vector<1x16x1xi32> to vector<1x16x1xf32>
    %124 = vector.shape_cast %121 : vector<8x32xf32> to vector<8x1x32xf32>
    %125 = vector.broadcast %124 : vector<8x1x32xf32> to vector<8x16x32xf32>
    %126 = vector.broadcast %123 : vector<1x16x1xf32> to vector<8x16x32xf32>
    %127 = arith.cmpf oeq, %125, %126 : vector<8x16x32xf32>
    %c0_31 = arith.constant 0 : index
    %c0_32 = arith.constant 0 : index
    %128 = vector.load %arg5[%c0_31, %c0_32] : memref<16x32xf32, #tpu.memory_space<vmem>>, vector<16x32xf32>
    %129 = vector.shape_cast %128 : vector<16x32xf32> to vector<1x16x32xf32>
    %cst_33 = arith.constant 0.000000e+00 : f32
    %130 = vector.shape_cast %129 : vector<1x16x32xf32> to vector<1x16x32xf32>
    %131 = vector.broadcast %130 : vector<1x16x32xf32> to vector<8x16x32xf32>
    %132 = vector.broadcast %cst_33 : f32 to vector<8x16x32xf32>
    %133 = arith.select %127, %131, %132 : vector<8x16x32xi1>, vector<8x16x32xf32>
    %cst_34 = arith.constant dense<0.000000e+00> : vector<8x32xf32>
    %134 = vector.multi_reduction <add>, %133, %cst_34 [1] : vector<8x16x32xf32> to vector<8x32xf32>
    %135 = arith.fptosi %134 : vector<8x32xf32> to vector<8x32xi32>
    %c0_35 = arith.constant 0 : index
    %c0_36 = arith.constant 0 : index
    %136 = vector.load %arg7[%c0_35, %c0_36] : memref<8x32xi32, #tpu.memory_space<vmem>>, vector<8x32xi32>
    tpu.vector_store %arg7[%c0_35, %c0_36], %135 {strides = array<i32>} : memref<8x32xi32, #tpu.memory_space<vmem>>, vector<8x32xi32>,
    %137 = arith.truncf %7 : vector<8x64xf32> to vector<8x64xbf16>
    %c0_37 = arith.constant 0 : index
    %c0_38 = arith.constant 0 : index
    %138 = vector.load %arg4[%c0_37, %c0_38] : memref<64x128xbf16, #tpu.memory_space<vmem>>, vector<64x128xbf16>
    %cst_39 = arith.constant dense<0.000000e+00> : vector<8x128xf32>
    %139 = tpu.matmul %137, %138, %cst_39 {dimension_numbers = #tpu.dot_dimension_numbers<[1], [0], [0], [1], [0, 0, 1, 1], [], []>} : vector<8x64xbf16>, vector<64x128xbf16>, vector<8x128xf32> -> vector<8x128xf32>
    %140 = tpu.iota {dimensions = array<i32: 2>} : vector<1x1x128xi32>
    %141 = arith.sitofp %140 : vector<1x1x128xi32> to vector<1x1x128xf32>
    %142 = vector.shape_cast %134 : vector<8x32xf32> to vector<8x32x1xf32>
    %143 = vector.broadcast %142 : vector<8x32x1xf32> to vector<8x32x128xf32>
    %144 = vector.broadcast %141 : vector<1x1x128xf32> to vector<8x32x128xf32>
    %145 = arith.cmpf oeq, %143, %144 : vector<8x32x128xf32>
    %146 = vector.shape_cast %139 : vector<8x128xf32> to vector<8x1x128xf32>
    %cst_40 = arith.constant 0.000000e+00 : f32
    %147 = vector.shape_cast %146 : vector<8x1x128xf32> to vector<8x1x128xf32>
    %148 = vector.broadcast %147 : vector<8x1x128xf32> to vector<8x32x128xf32>
    %149 = vector.broadcast %cst_40 : f32 to vector<8x32x128xf32>
    %150 = arith.select %145, %148, %149 : vector<8x32x128xi1>, vector<8x32x128xf32>
    %cst_41 = arith.constant dense<0.000000e+00> : vector<8x32xf32>
    %151 = vector.multi_reduction <add>, %150, %cst_41 [2] : vector<8x32x128xf32> to vector<8x32xf32>
    %152 = arith.negf %151 : vector<8x32xf32>
    %153 = math.exp %152 : vector<8x32xf32>
    %cst_42 = arith.constant 1.000000e+00 : f32
    %154 = vector.broadcast %cst_42 : f32 to vector<8x32xf32>
    %155 = arith.addf %154, %153 : vector<8x32xf32>
    %156 = arith.divf %154, %155 : vector<8x32xf32>
    %157 = arith.mulf %156, %118 : vector<8x32xf32>
    %c0_43 = arith.constant 0 : index
    %c0_44 = arith.constant 0 : index
    %158 = vector.load %arg8[%c0_43, %c0_44] : memref<8x32xf32, #tpu.memory_space<vmem>>, vector<8x32xf32>
    tpu.vector_store %arg8[%c0_43, %c0_44], %157 {strides = array<i32>} : memref<8x32xf32, #tpu.memory_space<vmem>>, vector<8x32xf32>,
    return
  }
  func.func @transform_0(%arg0: i32) -> (i32, i32) {
    %c0_i32 = arith.constant 0 : i32
    %c0_i32_0 = arith.constant 0 : i32
    %c0_i32_1 = arith.constant 0 : i32
    return %c0_i32, %c0_i32_0 : i32, i32
  }
  func.func @transform_1(%arg0: i32) -> (i32, i32) {
    %c0_i32 = arith.constant 0 : i32
    %c0_i32_0 = arith.constant 0 : i32
    %c0_i32_1 = arith.constant 0 : i32
    return %c0_i32, %c0_i32_0 : i32, i32
  }
  func.func @transform_2(%arg0: i32) -> (i32, i32) {
    %c0_i32 = arith.constant 0 : i32
    %c0_i32_0 = arith.constant 0 : i32
    %c0_i32_1 = arith.constant 0 : i32
    return %c0_i32, %c0_i32_0 : i32, i32
  }
  func.func @transform_3(%arg0: i32) -> (i32, i32) {
    %c0_i32 = arith.constant 0 : i32
    %c0_i32_0 = arith.constant 0 : i32
    %c0_i32_1 = arith.constant 0 : i32
    return %c0_i32, %c0_i32_0 : i32, i32
  }
  func.func @transform_4(%arg0: i32) -> (i32, i32) {
    %c0_i32 = arith.constant 0 : i32
    %c0_i32_0 = arith.constant 0 : i32
    %c0_i32_1 = arith.constant 0 : i32
    return %c0_i32, %c0_i32_0 : i32, i32
  }
  func.func @transform_5(%arg0: i32) -> (i32, i32) {
    %c0_i32 = arith.constant 0 : i32
    %c0_i32_0 = arith.constant 0 : i32
    %c0_i32_1 = arith.constant 0 : i32
    return %c0_i32, %c0_i32_0 : i32, i32
  }
  func.func @transform_6(%arg0: i32) -> (i32, i32) {
    %c0_i32 = arith.constant 0 : i32
    %c0_i32_0 = arith.constant 0 : i32
    %c0_i32_1 = arith.constant 0 : i32
    return %c0_i32, %c0_i32_0 : i32, i32
  }
  func.func @transform_7(%arg0: i32) -> (i32, i32) {
    %c0_i32 = arith.constant 0 : i32
    %c0_i32_0 = arith.constant 0 : i32
    %c0_i32_1 = arith.constant 0 : i32
    return %c0_i32, %c0_i32_0 : i32, i32
  }
}

</mosaic_0001>

<bundles_post_ra>
// kernel: lightxml_forward.1
= control target key start
LH: loop header
LB: loop body
LE: loop exit
PB: predicated region body
PF: predicated region fallthrough
CT: control target
= control target key end

     0   :  { %13 = vsyncpa [#allocation3], 0  ;;  %v1913_v1 = vmov 0.0   ;;  %vm1914_vm0 = vmmov 0   ;;  %s2439_s0 = inlined_call_operand.vmem [shape: bf16[8,64], index: 0, kind: input, shape index: {}]   ;;  %s2440_s1 = inlined_call_operand.vmem [shape: bf16[64,128], index: 1, kind: input, shape index: {}]   ;;  %s2441_s2 = inlined_call_operand.vmem [shape: f32[1,128], index: 2, kind: input, shape index: {}]   ;;  %s2442_s3 = inlined_call_operand.vmem [shape: bf16[64,128], index: 3, kind: input, shape index: {}]   ;;  %s2443_s4 = inlined_call_operand.vmem [shape: f32[16,32], index: 4, kind: input, shape index: {}]   ;;  %s2444_s5 = inlined_call_operand.hbm [shape: f32[8,16], index: 5, kind: output, shape index: {0}]   ;;  %s2445_s6 = inlined_call_operand.hbm [shape: s32[8,32], index: 6, kind: output, shape index: {1}]   ;;  %s2446_s7 = inlined_call_operand.hbm [shape: f32[8,32], index: 7, kind: output, shape index: {2}]  }
   0x1   :  { %v1691_v0 = vld [vmem:[%s2440_s1] sm:$0xff]   ;;  %1641 = vmatprep.subr.bf16.mxu0 %v1913_v1  ;;  %1653 = vmatprep.subr.bf16.mxu1 %v1913_v1  ;;  %v1692_v2 = vld [vmem:[%s2440_s1 + $0x8] sm:$0xff]   ;;  %v1693_v3 = vld [vmem:[%s2440_s1 + $0x10] sm:$0xff]  }
   0x2   :  { %1642 = vmatpush3.bf16.msra.mxu0 %v1691_v0  ;;  %1649 = vmatprep.mubr.msk.bf16.mxu0 %vm1914_vm0, %v1913_v1 }
   0x3   :  { %1643 = vmatprep.subr.bf16.mxu0 %v1913_v1  ;;  %1661 = vmatprep.mubr.msk.bf16.mxu1 %vm1914_vm0, %v1913_v1 }
   0x6   :  { %1644 = vmatpush3.bf16.msra.mxu0 %v1692_v2 }
   0x7   :  { %1645 = vmatprep.subr.bf16.mxu0 %v1913_v1 }
   0x8   :  { %14 = vsyncpa [#allocation5], 0  ;;  %v1694_v4 = vld [vmem:[%s2440_s1 + $0x18] sm:$0xff]   ;;  %v26_v5 = vld [vmem:[%s2439_s0] sm:$0xf]  ;;  %vm66_vm1 = vcmask 523264   ;;  %v112_v13 = vlaneseq }
   0x9   :  { %v1584_v6 = vld [vmem:[%s2441_s2] ss:$0 sm:$0xff]  ;;  %vm110_vm2 = vcmask 130048   ;;  %v1696_v26 = vld [vmem:[%s2442_s3 + $0x8] sm:$0xff]   ;;  %v1697_v27 = vld [vmem:[%s2442_s3 + $0x10] sm:$0xff]   ;;  %s1915_s18 = smov 112  }
   0xa   :  { %1646 = vmatpush3.bf16.msra.mxu0 %v1693_v3  ;;  %v1983_v14 = vand.u32 127, %v112_v13  ;;  %v1695_v25 = vld [vmem:[%s2442_s3] sm:$0xff]   ;;  %v1698_v31 = vld [vmem:[%s2442_s3 + $0x18] sm:$0xff]   ;;  %s1919_s23 = smov [#allocation2]  }
   0xb   :  { %1647 = vmatprep.subr.bf16.mxu0 %v1913_v1  ;;  %1654 = vmatpush3.bf16.msra.mxu1 %v1695_v25  ;;  %s1549_s24 = sshll.u32 %s1919_s23, 4  ;;  %s1550_s24 = int_to_ptr.vmem [resolvable:$true] %s1549_s24 }
   0xc   :  { %v1986_v15 = vcvt.s32.f32 %v1983_v14  ;;  %1655 = vmatprep.subr.bf16.mxu1 %v1913_v1  ;;  %vm144_vm10 = vcmp.ge.s32.totalorder %v1983_v14, 8  ;;  %vm145_vm11 = vcmp.lt.s32.totalorder %v1983_v14, 16  ;;  %vm165_vm12 = vcmp.ge.s32.totalorder %v1983_v14, 16 }
   0xd   :  { %vm166_vm13 = vcmp.lt.s32.totalorder %v1983_v14, 24  ;;  %vm124_vm14 = vcmp.lt.s32.totalorder %v1983_v14, 8  ;;  %vm186_vm15 = vcmp.ge.s32.totalorder %v1983_v14, 24  ;;  %vm187_vm0 = vcmp.lt.s32.totalorder %v1983_v14, 32 }
   0xe   :  { %1648 = vmatpush3.bf16.msra.mxu0 %v1694_v4 }
   0xf   :  { %1656 = vmatpush3.bf16.msra.mxu1 %v1696_v26 }
  0x10   :  { %1657 = vmatprep.subr.bf16.mxu1 %v1913_v1 }
  0x11   :  { %1650 = vmatmul.mubr.msk.bf16.vlgmr.msra.gmra.mrb[0].mxu0 %vm66_vm1, %v26_v5 }
  0x13   :  { %1658 = vmatpush3.bf16.msra.mxu1 %v1697_v27 }
  0x14   :  { %1659 = vmatprep.subr.bf16.mxu1 %v1913_v1  ;;  %v2044_v1 = vshrl.u32 %v112_v13, 7 }
  0x16   :  { %v1091_v13 = vsub.s32 3, %v2044_v1 }
  0x17   :  { %1660 = vmatpush3.bf16.msra.mxu1 %v1698_v31 }
  0xe4   :  { %v104_v7 = vpop.f32.mrb[0].mxu0 }
  0xe5   :  { %v105_v8 = vadd.f32 %v1584_v6, %v104_v7  ;;  %v1651_v9 = vpop.f32.mrb[1].mxu0  ;;  %v2055_v6 = vsub.s32 0, %v2044_v1 }
  0xe6   :  { %v107_v10 = vpop.f32.mrb[2].mxu0  ;;  %v1053_v9 = vsub.s32 1, %v2044_v1 }
  0xe7   :  { %v1652_v11 = vpop.f32.mrb[3].mxu0  ;;  %v115_v12 = vsel %vm110_vm2, %v105_v8, -inf  ;;  %111 = vst.msk [vmem:[#allocation2] sm:$0xff] %vm110_vm2, %v105_v8  ;;  %v422_v32 = vpack.c.bf16 %v105_v8, %v105_v8 }
  0xe8   :  { %116 = vmax.xlane.f32.xlu0 %v115_v12  ;;  %v1072_v11 = vsub.s32 2, %v2044_v1 }
 0x175   :  { %v117_v16 = vpop.xlane.xlu0 %116 }
 0x176   :  { %vm118_vm3 = vcmp.eq.f32.partialorder %v105_v8, %v117_v16  ;;  %v1590_v44 = vmul.f32 -1.442695, %v117_v16 }
 0x177   :  { %v119_v17 = vsel %vm118_vm3, %v1986_v15, 16.0  ;;  %vm2046_vm3 = vmand %vm186_vm15, %vm187_vm0 }
 0x178   :  { %v120_v18 = vsel %vm110_vm2, %v119_v17, inf  ;;  %1699 = vpow2.f32 %v1590_v44  ;;  %v1110_v17 = vsub.s32 4, %v2044_v1 }
 0x179   :  { %121 = vmin.xlane.f32.xlu0 %v120_v18 }
 0x182   :  { %v1700_v51 = vpop.eup %1699 }
 0x183   :  { %v129_v54 = vadd.f32 1.0, %v1700_v51 }
 0x206   :  { %v1990_v19 = vpop.xlane.xlu0 %121 }
 0x207   :  { %vm134_vm4 = vcmp.eq.f32.partialorder %v1986_v15, %v1990_v19  ;;  %v133_v27 = vsel %vm124_vm14, %v1990_v19, 0.0 }
 0x208   :  { %v135_v20 = vsel %vm134_vm4, -1e+30, %v105_v8 }
 0x209   :  { %v136_v21 = vsel %vm110_vm2, %v135_v20, -inf }
 0x20a   :  { %137 = vmax.xlane.f32.xlu1 %v136_v21 }
 0x297   :  { %v138_v22 = vpop.xlane.xlu1 %137 }
 0x298   :  { %vm139_vm5 = vcmp.eq.f32.partialorder %v135_v20, %v138_v22  ;;  %v1591_v45 = vmul.f32 -1.442695, %v138_v22  ;;  %v1148_v22 = vsub.s32 6, %v2044_v1 }
 0x299   :  { %v140_v23 = vsel %vm139_vm5, %v1986_v15, 16.0 }
 0x29a   :  { %v141_v24 = vsel %vm110_vm2, %v140_v23, inf  ;;  %1701 = vpow2.f32 %v1591_v45 }
 0x29b   :  { %142 = vmin.xlane.f32.xlu1 %v141_v24  ;;  %v1916_v24 = vmov 1966171168  }
 0x29c   :  { %v205_v25 = vunpack.c.l.s4 %v1916_v24 }
 0x29e   :  { %v206_v26 = vunpack.c.0.s8 %v205_v25 }
 0x2a0   :  { %v2090_v31 = vsub.s32 %v206_v26, %v2044_v1 }
 0x2a4   :  { %v1702_v52 = vpop.eup %1701 }
 0x2a5   :  { %v150_v55 = vadd.f32 1.0, %v1702_v52 }
 0x328   :  { %v2006_v28 = vpop.xlane.xlu1 %142 }
 0x329   :  { %vm155_vm6 = vcmp.eq.f32.partialorder %v1986_v15, %v2006_v28 }
 0x32a   :  { %v156_v29 = vsel %vm155_vm6, -1e+30, %v135_v20  ;;  %v1129_v20 = vsub.s32 5, %v2044_v1 }
 0x32b   :  { %v157_v30 = vsel %vm110_vm2, %v156_v29, -inf }
 0x32c   :  { %158 = vmax.xlane.f32.xlu0 %v157_v30 }
 0x342   :  { %432 = vrot.lane.b32.xlu0 %v422_v32, %s1915_s18 }
 0x3b9   :  { %v159_v33 = vpop.xlane.xlu0 %158 }
 0x3ba   :  { %vm160_vm7 = vcmp.eq.f32.partialorder %v156_v29, %v159_v33  ;;  %v1592_v46 = vmul.f32 -1.442695, %v159_v33  ;;  %v199_v33 = vadd.s32 8, %v2044_v1 }
 0x3bb   :  { %v161_v34 = vsel %vm160_vm7, %v1986_v15, 16.0 }
 0x3bc   :  { %v162_v35 = vsel %vm110_vm2, %v161_v34, inf  ;;  %1703 = vpow2.f32 %v1592_v46 }
 0x3bd   :  { %163 = vmin.xlane.f32.xlu1 %v162_v35  ;;  %v433_v36 = vpop.permute.xlu0 %432 }
 0x3be   :  { %1662 = vmatmul.mubr.msk.bf16.vlgmr.msra.gmra.mrb[0].mxu1 %vm66_vm1, %v433_v36  ;;  %vm2033_vm1 = vmand %vm144_vm10, %vm145_vm11 }
 0x3c6   :  { %v1704_v53 = vpop.eup %1703 }
 0x3c7   :  { %v171_v56 = vadd.f32 1.0, %v1704_v53 }
 0x44a   :  { %v2017_v37 = vpop.xlane.xlu1 %163 }
 0x44b   :  { %vm176_vm8 = vcmp.eq.f32.partialorder %v1986_v15, %v2017_v37 }
 0x44c   :  { %v177_v38 = vsel %vm176_vm8, -1e+30, %v156_v29  ;;  %v154_v29 = vsel %vm2033_vm1, %v2006_v28, %v133_v27 }
 0x44d   :  { %v178_v39 = vsel %vm110_vm2, %v177_v38, -inf }
 0x44e   :  { %179 = vmax.xlane.f32.xlu1 %v178_v39  ;;  %v200_v39 = vcvt.s32.f32 %v2044_v1 }
 0x491   :  { %v2022_v40 = vpop.f32.mrb[0].mxu1 }
 0x492   :  { %v1663_v41 = vpop.f32.mrb[1].mxu1 }
 0x493   :  { %v498_v42 = vpop.f32.mrb[2].mxu1 }
 0x494   :  { %v1664_v43 = vpop.f32.mrb[3].mxu1 }
 0x4db   :  { %v180_v47 = vpop.xlane.xlu1 %179 }
 0x4dc   :  { %v1593_v48 = vmul.f32 -1.442695, %v180_v47  ;;  %vm181_vm9 = vcmp.eq.f32.partialorder %v177_v38, %v180_v47 }
 0x4dd   :  { %v182_v49 = vsel %vm181_vm9, %v1986_v15, 16.0 }
 0x4de   :  { %1705 = vpow2.f32 %v1593_v48  ;;  %v183_v50 = vsel %vm110_vm2, %v182_v49, inf  ;;  %vm2037_vm2 = vmand %vm165_vm12, %vm166_vm13 }
 0x4df   :  { %184 = vmin.xlane.f32.xlu1 %v183_v50  ;;  %1707 = vrcp.f32 %v129_v54  ;;  %v175_v30 = vsel %vm2037_vm2, %v2017_v37, %v154_v29  ;;  %v201_v37 = vcvt.s32.f32 %v199_v33 }
 0x4e0   :  { %1709 = vrcp.f32 %v150_v55 }
 0x4e1   :  { %1711 = vrcp.f32 %v171_v56  ;;  %v308_v56 = vld [vmem:[%s2443_s4] sm:$0xff] }
 0x4e8   :  { %v1706_v57 = vpop.eup %1705 }
 0x4e9   :  { %v192_v58 = vadd.f32 1.0, %v1706_v57  ;;  %v1708_v59 = vpop.eup %1707  ;;  %v309_v57 = vld [vmem:[%s2443_s4 + $0x8] sm:$0xff]  ;;  %s1918_s4 = smov [#allocation4]  }
 0x4ea   :  { %v1710_v60 = vpop.eup %1709  ;;  %v132_v0 = vsel %vm124_vm14, %v1708_v59, 0.0  ;;  %s1559_s22 = sshll.u32 %s1918_s4, 4  ;;  %s1560_s22 = int_to_ptr.vmem [resolvable:$true] %s1559_s22 }
 0x4eb   :  { %1713 = vrcp.f32 %v192_v58  ;;  %v1712_v62 = vpop.eup %1711  ;;  %v153_v3 = vsel %vm2033_vm1, %v1710_v60, %v132_v0  ;;  %s1843_s25 = scalar_lea.vmem %s1560_s22, 128  ;;  %p1848_p1 = scmp.lt.s32.totalorder %s1560_s22, %s1560_s22 }
 0x4ec   :  { %v174_v5 = vsel %vm2037_vm2, %v1712_v62, %v153_v3  ;;  %p1844_p0 = scmp.ne.s32.totalorder %s1560_s22, %s1843_s25  ;;  %p1849_p2 = scmp.lt.s32.totalorder %s1843_s25, %s1843_s25 }
 0x4ee   :  { %p1850_p3 = por %p1849_p2, %p1848_p1 }
 0x4f0   :  { %p1851_p4 = pnand %p1850_p3, %p1844_p0 }
 0x4f5   :  { %v1714_v4 = vpop.eup %1713 }
 0x4f6   :  { %v2059_v7 = vsel %vm2046_vm3, %v1714_v4, %v174_v5 }
 0x4f7   :  { %v1035_v8 = vrot.slane %v2059_v7, %v2055_v6  ;;  %v1054_v10 = vrot.slane %v2059_v7, %v1053_v9  ;;  %v1073_v12 = vrot.slane %v2059_v7, %v1072_v11  ;;  %v1092_v16 = vrot.slane %v2059_v7, %v1091_v13 }
 0x4f8   :  { %v1111_v18 = vrot.slane %v2059_v7, %v1110_v17  ;;  %v1130_v21 = vrot.slane %v2059_v7, %v1129_v20  ;;  %v2075_v23 = vrot.slane %v2059_v7, %v1148_v22 }
 0x4f9   :  { %1041 = vbcast.lane.b32.xlu0 %v1035_v8, 264  ;;  %1037 = vbcast.lane.b32.xlu1 %v1035_v8, 256 }
 0x4fd   :  { %1060 = vbcast.lane.b32.xlu0 %v1054_v10, 264  ;;  %1045 = vbcast.lane.b32.xlu1 %v1035_v8, 272 }
 0x501   :  { %1068 = vbcast.lane.b32.xlu0 %v1054_v10, 280  ;;  %1049 = vbcast.lane.b32.xlu1 %v1035_v8, 280 }
 0x505   :  { %1079 = vbcast.lane.b32.xlu0 %v1073_v12, 264  ;;  %1056 = vbcast.lane.b32.xlu1 %v1054_v10, 256 }
 0x509   :  { %1087 = vbcast.lane.b32.xlu0 %v1073_v12, 280  ;;  %1064 = vbcast.lane.b32.xlu1 %v1054_v10, 272 }
 0x50d   :  { %1098 = vbcast.lane.b32.xlu0 %v1092_v16, 264  ;;  %1075 = vbcast.lane.b32.xlu1 %v1073_v12, 256 }
 0x511   :  { %1106 = vbcast.lane.b32.xlu0 %v1092_v16, 280  ;;  %1083 = vbcast.lane.b32.xlu1 %v1073_v12, 272 }
 0x515   :  { %1117 = vbcast.lane.b32.xlu0 %v1111_v18, 264  ;;  %1094 = vbcast.lane.b32.xlu1 %v1092_v16, 256 }
 0x519   :  { %1132 = vbcast.lane.b32.xlu0 %v1130_v21, 256  ;;  %1102 = vbcast.lane.b32.xlu1 %v1092_v16, 272 }
 0x51d   :  { %1125 = vbcast.lane.b32.xlu0 %v1111_v18, 280  ;;  %1113 = vbcast.lane.b32.xlu1 %v1111_v18, 256 }
 0x521   :  { %1151 = vbcast.lane.b32.xlu0 %v2075_v23, 256  ;;  %1121 = vbcast.lane.b32.xlu1 %v1111_v18, 272 }
 0x525   :  { %1144 = vbcast.lane.b32.xlu0 %v1130_v21, 280  ;;  %1136 = vbcast.lane.b32.xlu1 %v1130_v21, 264 }
 0x529   :  { %1140 = vbcast.lane.b32.xlu1 %v1130_v21, 272 }
 0x52d   :  { %1155 = vbcast.lane.b32.xlu1 %v2075_v23, 264 }
 0x531   :  { %1159 = vbcast.lane.b32.xlu1 %v2075_v23, 272 }
 0x56c   :  { %v185_v32 = vpop.xlane.xlu1 %184 }
 0x56d   :  { %v196_v34 = vsel %vm2046_vm3, %v185_v32, %v175_v30 }
 0x56e   :  { %v203_v35 = vcombine.high %v196_v34, %v196_v34  ;;  %v210_v19 = vrot.slane %v196_v34, %v2090_v31 }
 0x570   :  { %v217_v36 = vrot.slane %v203_v35, %v2090_v31  ;;  %v218_v38 = vcombine.high %v210_v19, %v210_v19  ;;  %v226_v28 = vrot.slane %v210_v19, %v2090_v31 }
 0x572   :  { %v219_v41 = vcombine.high %v217_v36, %v217_v36  ;;  %v233_v42 = vrot.slane %v217_v36, %v2090_v31  ;;  %v240_v43 = vrot.slane %v218_v38, %v2090_v31  ;;  %v248_v44 = vcombine.high %v226_v28, %v226_v28 }
 0x573   :  { %v255_v45 = vrot.slane %v226_v28, %v2055_v6 }
 0x574   :  { %v247_v46 = vrot.slane %v219_v41, %v2090_v31  ;;  %v249_v47 = vcombine.high %v233_v42, %v233_v42  ;;  %v250_v48 = vcombine.high %v240_v43, %v240_v43  ;;  %v259_v49 = vrot.slane %v240_v43, %v2055_v6 }
 0x575   :  { %v263_v50 = vrot.slane %v248_v44, %v2055_v6  ;;  %v271_v51 = vrot.slane %v233_v42, %v2055_v6  ;;  %vm292_vm5 = vcmp.eq.f32.partialorder %v255_v45, %v200_v39  ;;  %vm293_vm6 = vcmp.eq.f32.partialorder %v255_v45, %v201_v37 }
 0x576   :  { %v251_v52 = vcombine.high %v247_v46, %v247_v46  ;;  %v267_v53 = vrot.slane %v250_v48, %v2055_v6  ;;  %v275_v54 = vrot.slane %v247_v46, %v2055_v6  ;;  %v279_v55 = vrot.slane %v249_v47, %v2055_v6 }
 0x577   :  { %vm294_vm7 = vcmp.eq.f32.partialorder %v259_v49, %v200_v39  ;;  %vm295_vm8 = vcmp.eq.f32.partialorder %v259_v49, %v201_v37  ;;  %vm296_vm9 = vcmp.eq.f32.partialorder %v263_v50, %v200_v39  ;;  %vm297_vm10 = vcmp.eq.f32.partialorder %v263_v50, %v201_v37 }
 0x578   :  { %v283_v58 = vrot.slane %v251_v52, %v2055_v6  ;;  %vm298_vm11 = vcmp.eq.f32.partialorder %v267_v53, %v200_v39  ;;  %vm299_vm12 = vcmp.eq.f32.partialorder %v267_v53, %v201_v37  ;;  %vm300_vm13 = vcmp.eq.f32.partialorder %v271_v51, %v200_v39 }
 0x579   :  { %vm301_vm14 = vcmp.eq.f32.partialorder %v271_v51, %v201_v37  ;;  %vm302_vm15 = vcmp.eq.f32.partialorder %v275_v54, %v200_v39  ;;  %vm303_vm0 = vcmp.eq.f32.partialorder %v275_v54, %v201_v37  ;;  %vm304_vm1 = vcmp.eq.f32.partialorder %v279_v55, %v200_v39 }
 0x57a   :  { %vm305_vm2 = vcmp.eq.f32.partialorder %v279_v55, %v201_v37  ;;  %vm306_vm3 = vcmp.eq.f32.partialorder %v283_v58, %v200_v39  ;;  %vm307_vm4 = vcmp.eq.f32.partialorder %v283_v58, %v201_v37  ;;  %v310_v59 = vsel %vm292_vm5, %v308_v56, 0.0 }
 0x57b   :  { %v311_v60 = vsel %vm293_vm6, %v309_v57, 0.0  ;;  %v312_v61 = vsel %vm294_vm7, %v308_v56, 0.0  ;;  %v313_v62 = vsel %vm295_vm8, %v309_v57, 0.0  ;;  %v314_v63 = vsel %vm296_vm9, %v308_v56, 0.0 }
 0x57c   :  { %v315_v0 = vsel %vm297_vm10, %v309_v57, 0.0  ;;  %v316_v2 = vsel %vm298_vm11, %v308_v56, 0.0  ;;  %v317_v3 = vsel %vm299_vm12, %v309_v57, 0.0  ;;  %v318_v4 = vsel %vm300_vm13, %v308_v56, 0.0 }
 0x57d   :  { %v319_v5 = vsel %vm301_vm14, %v309_v57, 0.0  ;;  %v320_v8 = vsel %vm302_vm15, %v308_v56, 0.0  ;;  %v321_v9 = vsel %vm303_vm0, %v309_v57, 0.0  ;;  %v322_v10 = vsel %vm304_vm1, %v308_v56, 0.0 }
 0x57e   :  { %v323_v11 = vsel %vm305_vm2, %v309_v57, 0.0  ;;  %v324_v12 = vsel %vm306_vm3, %v308_v56, 0.0  ;;  %v325_v13 = vsel %vm307_vm4, %v309_v57, 0.0  ;;  %vm2453_vm5 = vcmask 261120  }
 0x57f   :  { %v327_v16 = vsel %vm2453_vm5, %v310_v59, 0.0  ;;  %vm2454_vm6 = vmmov %vm2453_vm5 }
 0x580   :  { %v328_v17 = vsel %vm2454_vm6, %v311_v60, 0.0  ;;  %vm2455_vm7 = vmmov %vm2453_vm5  ;;  %vm409_vm6 = vcmask 1042434  }
 0x581   :  { %v336_v18 = vsel %vm2455_vm7, %v312_v61, 0.0  ;;  %vm2456_vm8 = vmmov %vm2453_vm5  ;;  %v329_v22 = vadd.f32 %v328_v17, %v327_v16  ;;  %vm411_vm7 = vcmask 1043459  }
 0x582   :  { %v337_v20 = vsel %vm2456_vm8, %v313_v62, 0.0  ;;  %vm2457_vm9 = vmmov %vm2453_vm5  ;;  %vm413_vm8 = vcmask 1044484  }
 0x583   :  { %v345_v21 = vsel %vm2457_vm9, %v314_v63, 0.0  ;;  %v338_v24 = vadd.f32 %v337_v20, %v336_v18  ;;  %vm2458_vm10 = vmmov %vm2453_vm5  ;;  %v330_v33 = vrot.slane %v329_v22, 4  ;;  %vm415_vm9 = vcmask 1045509  }
 0x584   :  { %v346_v25 = vsel %vm2458_vm10, %v315_v0, 0.0  ;;  %vm2459_vm11 = vmmov %vm2453_vm5  ;;  %vm417_vm10 = vcmask 1046534  }
 0x585   :  { %v354_v26 = vsel %vm2459_vm11, %v316_v2, 0.0  ;;  %v347_v27 = vadd.f32 %v346_v25, %v345_v21  ;;  %vm2460_vm12 = vmmov %vm2453_vm5  ;;  %v339_v34 = vrot.slane %v338_v24, 4  ;;  %v331_v37 = vadd.f32 %v330_v33, %v329_v22 }
 0x586   :  { %v355_v29 = vsel %vm2460_vm12, %v317_v3, 0.0  ;;  %vm2461_vm4 = vmmov %vm2453_vm5  ;;  %vm407_vm5 = vcmask 1041409   ;;  %vm419_vm11 = vcmask 1047559  }
 0x587   :  { %v363_v30 = vsel %vm2461_vm4, %v318_v4, 0.0  ;;  %vm2462_vm13 = vmmov %vm2461_vm4  ;;  %v356_v35 = vadd.f32 %v355_v29, %v354_v26  ;;  %v348_v36 = vrot.slane %v347_v27, 4  ;;  %v340_v41 = vadd.f32 %v339_v34, %v338_v24 }
 0x588   :  { %v364_v32 = vsel %vm2462_vm13, %v319_v5, 0.0  ;;  %vm2463_vm14 = vmmov %vm2461_vm4  ;;  %v332_v48 = vrot.slane %v331_v37, 2 }
 0x589   :  { %v365_v19 = vadd.f32 %v364_v32, %v363_v30  ;;  %v372_v38 = vsel %vm2463_vm14, %v320_v8, 0.0  ;;  %vm2464_vm15 = vmmov %vm2461_vm4  ;;  %v357_v42 = vrot.slane %v356_v35, 4  ;;  %v349_v44 = vadd.f32 %v348_v36, %v347_v27 }
 0x58a   :  { %v373_v28 = vsel %vm2464_vm15, %v321_v9, 0.0  ;;  %vm2465_vm0 = vmmov %vm2461_vm4  ;;  %v341_v54 = vrot.slane %v340_v41, 2  ;;  %v333_v57 = vadd.f32 %v332_v48, %v331_v37 }
 0x58b   :  { %v381_v39 = vsel %vm2465_vm0, %v322_v10, 0.0  ;;  %v366_v43 = vrot.slane %v365_v19, 4  ;;  %v374_v45 = vadd.f32 %v373_v28, %v372_v38  ;;  %vm2466_vm1 = vmmov %vm2465_vm0  ;;  %v350_v55 = vrot.slane %v349_v44, 2 }
 0x58c   :  { %v382_v46 = vsel %vm2466_vm1, %v323_v11, 0.0  ;;  %vm2467_vm2 = vmmov %vm2465_vm0  ;;  %v358_v59 = vadd.f32 %v357_v42, %v356_v35  ;;  %v342_v60 = vadd.f32 %v341_v54, %v340_v41  ;;  %v334_v0 = vrot.slane %v333_v57, 1 }
 0x58d   :  { %v390_v47 = vsel %vm2467_vm2, %v324_v12, 0.0  ;;  %v367_v49 = vadd.f32 %v366_v43, %v365_v19  ;;  %v383_v50 = vadd.f32 %v382_v46, %v381_v39  ;;  %vm2468_vm3 = vmmov %vm2465_vm0  ;;  %v375_v52 = vrot.slane %v374_v45, 4 }
 0x58e   :  { %v391_v51 = vsel %vm2468_vm3, %v325_v13, 0.0  ;;  %v351_v61 = vadd.f32 %v350_v55, %v349_v44  ;;  %v359_v3 = vrot.slane %v358_v59, 2  ;;  %v343_v5 = vrot.slane %v342_v60, 1  ;;  %vm2469_vm12 = vmmov %vm2465_vm0 }
 0x58f   :  { %v392_v53 = vadd.f32 %v391_v51, %v390_v47  ;;  %v384_v56 = vrot.slane %v383_v50, 4  ;;  %v368_v58 = vrot.slane %v367_v49, 2  ;;  %v376_v62 = vadd.f32 %v375_v52, %v374_v45 }
 0x590   :  { %v352_v8 = vrot.slane %v351_v61, 1  ;;  %v335_v11 = vadd.f32 %v334_v0, %v333_v57  ;;  %v360_v13 = vadd.f32 %v359_v3, %v358_v59  ;;  %v344_v17 = vadd.f32 %v343_v5, %v342_v60 }
 0x591   :  { %v393_v63 = vrot.slane %v392_v53, 4  ;;  %v369_v2 = vadd.f32 %v368_v58, %v367_v49  ;;  %v385_v4 = vadd.f32 %v384_v56, %v383_v50  ;;  %v377_v9 = vrot.slane %v376_v62, 2  ;;  %v2156_v58 = vpop.permute.xlu1 %1037 }
 0x592   :  { %v353_v18 = vadd.f32 %v352_v8, %v351_v61  ;;  %506 = vbcast.lane.b32.xlu0 %v335_v11, 264  ;;  %502 = vbcast.lane.b32.xlu1 %v335_v11, 256  ;;  %v361_v24 = vrot.slane %v360_v13, 1  ;;  %v1665_v26 = vtrunc.f32 %v335_v11  ;;  %v1667_v30 = vtrunc.f32 %v344_v17  ;;  %v2162_v61 = vpop.permute.xlu0 %1041 }
 0x593   :  { %v394_v10 = vadd.f32 %v393_v63, %v392_v53  ;;  %v370_v12 = vrot.slane %v369_v2, 1  ;;  %v386_v16 = vrot.slane %v385_v4, 2  ;;  %v378_v20 = vadd.f32 %v377_v9, %v376_v62 }
 0x594   :  { %v1669_v32 = vtrunc.f32 %v353_v18  ;;  %v362_v33 = vadd.f32 %v361_v24, %v360_v13  ;;  %v1666_v35 = vcvt.f32.s32 %v1665_v26  ;;  %v1668_v28 = vcvt.f32.s32 %v1667_v30 }
 0x595   :  { %v395_v21 = vrot.slane %v394_v10, 2  ;;  %v371_v22 = vadd.f32 %v370_v12, %v369_v2  ;;  %v387_v25 = vadd.f32 %v386_v16, %v385_v4  ;;  %v379_v27 = vrot.slane %v378_v20, 1  ;;  %v2158_v59 = vpop.permute.xlu1 %1045 }
 0x596   :  { %v1670_v39 = vcvt.f32.s32 %v1669_v32  ;;  %514 = vbcast.lane.b32.xlu0 %v335_v11, 280  ;;  %510 = vbcast.lane.b32.xlu1 %v335_v11, 272  ;;  %v1671_v41 = vtrunc.f32 %v362_v33  ;;  %v408_v43 = vsel %vm407_vm5, %v1668_v28, %v1666_v35  ;;  %v2166_v63 = vpop.permute.xlu0 %1060  ;;  %v661_v26 = vrot.slane %v2022_v40, %v2090_v31 }
 0x597   :  { %v396_v29 = vadd.f32 %v395_v21, %v394_v10  ;;  %v388_v34 = vrot.slane %v387_v25, 1  ;;  %v1673_v19 = vtrunc.f32 %v371_v22  ;;  %v380_v36 = vadd.f32 %v379_v27, %v378_v20 }
 0x598   :  { %v410_v45 = vsel %vm409_vm6, %v1670_v39, %v408_v43  ;;  %v1672_v46 = vcvt.f32.s32 %v1671_v41  ;;  %v677_v27 = vrot.slane %v661_v26, %v2090_v31  ;;  %v669_v32 = vcombine.high %v661_v26, %v661_v26 }
 0x599   :  { %v397_v38 = vrot.slane %v396_v29, 1  ;;  %v389_v37 = vadd.f32 %v388_v34, %v387_v25  ;;  %v1675_v44 = vtrunc.f32 %v380_v36  ;;  %v1674_v48 = vcvt.f32.s32 %v1673_v19  ;;  %v2160_v60 = vpop.permute.xlu1 %1049 }
 0x59a   :  { %521 = vbcast.lane.b32.xlu0 %v344_v17, 264  ;;  %517 = vbcast.lane.b32.xlu1 %v344_v17, 256  ;;  %v412_v51 = vsel %vm411_vm7, %v1672_v46, %v410_v45  ;;  %v2170_v2 = vpop.permute.xlu0 %1068  ;;  %v654_v46 = vcombine.high %v2022_v40, %v2022_v40 }
 0x59b   :  { %v398_v42 = vadd.f32 %v397_v38, %v396_v29  ;;  %v1677_v47 = vtrunc.f32 %v389_v37  ;;  %v1676_v50 = vcvt.f32.s32 %v1675_v44  ;;  %v414_v53 = vsel %vm413_vm8, %v1674_v48, %v412_v51 }
 0x59c   :  { %v2217_v38 = vrot.slane %v669_v32, %v2090_v31 }
 0x59d   :  { %v1679_v49 = vtrunc.f32 %v398_v42  ;;  %v1678_v52 = vcvt.f32.s32 %v1677_v47  ;;  %v416_v55 = vsel %vm415_vm9, %v1676_v50, %v414_v53  ;;  %v2164_v62 = vpop.permute.xlu1 %1056  ;;  %v699_v47 = vcombine.high %v677_v27, %v677_v27 }
 0x59e   :  { %529 = vbcast.lane.b32.xlu0 %v344_v17, 280  ;;  %525 = vbcast.lane.b32.xlu1 %v344_v17, 272  ;;  %v2174_v4 = vpop.permute.xlu0 %1079  ;;  %v710_v41 = vrot.slane %v2217_v38, %v2055_v6 }
 0x59f   :  { %v1680_v54 = vcvt.f32.s32 %v1679_v49  ;;  %v418_v56 = vsel %vm417_vm10, %v1678_v52, %v416_v55  ;;  %v668_v52 = vrot.slane %v654_v46, %v2090_v31  ;;  %v714_v53 = vrot.slane %v699_v47, %v2055_v6 }
 0x5a1   :  { %v420_v57 = vsel %vm419_vm11, %v1680_v54, %v418_v56  ;;  %v2168_v0 = vpop.permute.xlu1 %1064 }
 0x5a2   :  { %421 = vst.msk [vmem:[#allocation4] sm:$0xff] %vm2469_vm12, %v420_v57  ;;  %536 = vbcast.lane.b32.xlu0 %v353_v18, 264  ;;  %532 = vbcast.lane.b32.xlu1 %v353_v18, 256  ;;  %v2178_v8 = vpop.permute.xlu0 %1087  ;;  %v2234_v57 = vrot.slane %v668_v52, %v2090_v31 }
 0x5a5   :  { %v2172_v3 = vpop.permute.xlu1 %1075 }
 0x5a6   :  { %544 = vbcast.lane.b32.xlu0 %v353_v18, 280  ;;  %540 = vbcast.lane.b32.xlu1 %v353_v18, 272  ;;  %v2182_v10 = vpop.permute.xlu0 %1098 }
 0x5a9   :  { %v2176_v5 = vpop.permute.xlu1 %1083 }
 0x5aa   :  { %566 = vbcast.lane.b32.xlu0 %v371_v22, 264  ;;  %562 = vbcast.lane.b32.xlu1 %v371_v22, 256  ;;  %v2186_v12 = vpop.permute.xlu0 %1106 }
 0x5ad   :  { %v2180_v9 = vpop.permute.xlu1 %1094 }
 0x5ae   :  { %574 = vbcast.lane.b32.xlu0 %v371_v22, 280  ;;  %570 = vbcast.lane.b32.xlu1 %v371_v22, 272  ;;  %v2190_v16 = vpop.permute.xlu0 %1117 }
 0x5b1   :  { %v2184_v11 = vpop.permute.xlu1 %1102 }
 0x5b2   :  { %551 = vbcast.lane.b32.xlu0 %v362_v33, 264  ;;  %547 = vbcast.lane.b32.xlu1 %v362_v33, 256  ;;  %v2194_v18 = vpop.permute.xlu0 %1132 }
 0x5b5   :  { %v2188_v13 = vpop.permute.xlu1 %1113 }
 0x5b6   :  { %559 = vbcast.lane.b32.xlu0 %v362_v33, 280  ;;  %555 = vbcast.lane.b32.xlu1 %v362_v33, 272  ;;  %v2198_v21 = vpop.permute.xlu0 %1125  ;;  %v706_v33 = vrot.slane %v677_v27, %v2055_v6 }
 0x5b9   :  { %v2192_v17 = vpop.permute.xlu1 %1121 }
 0x5ba   :  { %581 = vbcast.lane.b32.xlu0 %v380_v36, 264  ;;  %577 = vbcast.lane.b32.xlu1 %v380_v36, 256  ;;  %v2202_v24 = vpop.permute.xlu0 %1151 }
 0x5bd   :  { %v2196_v20 = vpop.permute.xlu1 %1136 }
 0x5be   :  { %589 = vbcast.lane.b32.xlu0 %v380_v36, 280  ;;  %585 = vbcast.lane.b32.xlu1 %v380_v36, 272  ;;  %v2209_v29 = vpop.permute.xlu0 %1144 }
 0x5c1   :  { %v2200_v22 = vpop.permute.xlu1 %1140 }
 0x5c2   :  { %596 = vbcast.lane.b32.xlu0 %v389_v37, 264  ;;  %592 = vbcast.lane.b32.xlu1 %v389_v37, 256 }
 0x5c5   :  { %v2204_v25 = vpop.permute.xlu1 %1155 }
 0x5c6   :  { %604 = vbcast.lane.b32.xlu0 %v389_v37, 280  ;;  %600 = vbcast.lane.b32.xlu1 %v389_v37, 272 }
 0x5c9   :  { %v2211_v30 = vpop.permute.xlu1 %1159 }
 0x5ca   :  { %611 = vbcast.lane.b32.xlu0 %v398_v42, 264  ;;  %607 = vbcast.lane.b32.xlu1 %v398_v42, 256 }
 0x5ce   :  { %619 = vbcast.lane.b32.xlu0 %v398_v42, 280  ;;  %615 = vbcast.lane.b32.xlu1 %v398_v42, 272 }
 0x604   :  { %v507_v34 = vpop.permute.xlu0 %506  ;;  %v503_v35 = vpop.permute.xlu1 %502 }
 0x605   :  { %vm622_vm4 = vcmp.eq.f32.partialorder %v507_v34, %v1986_v15  ;;  %vm621_vm13 = vcmp.eq.f32.partialorder %v503_v35, %v1986_v15  ;;  %v722_v34 = vrot.slane %v2234_v57, %v2055_v6 }
 0x606   :  { %v744_v19 = vsel %vm622_vm4, %v706_v33, 0.0  ;;  %v743_v36 = vsel %vm621_vm13, %v706_v33, 0.0 }
 0x607   :  { %777 = vadd.xlane.f32.xlu0 %v744_v19  ;;  %775 = vadd.xlane.f32.xlu1 %v743_v36 }
 0x608   :  { %v515_v28 = vpop.permute.xlu0 %514  ;;  %v511_v39 = vpop.permute.xlu1 %510 }
 0x609   :  { %vm623_vm14 = vcmp.eq.f32.partialorder %v511_v39, %v1986_v15  ;;  %vm624_vm15 = vcmp.eq.f32.partialorder %v515_v28, %v1986_v15  ;;  %v701_v39 = vcombine.high %v2217_v38, %v2217_v38 }
 0x60a   :  { %v745_v37 = vsel %vm623_vm14, %v706_v33, 0.0  ;;  %v746_v44 = vsel %vm624_vm15, %v706_v33, 0.0 }
 0x60b   :  { %779 = vadd.xlane.f32.xlu0 %v745_v37  ;;  %v718_v47 = vrot.slane %v701_v39, %v2055_v6 }
 0x60c   :  { %v522_v42 = vpop.permute.xlu0 %521  ;;  %v518_v43 = vpop.permute.xlu1 %517 }
 0x60d   :  { %vm625_vm0 = vcmp.eq.f32.partialorder %v518_v43, %v1986_v15  ;;  %vm626_vm1 = vcmp.eq.f32.partialorder %v522_v42, %v1986_v15 }
 0x60e   :  { %v747_v45 = vsel %vm625_vm0, %v710_v41, 0.0  ;;  %v748_v50 = vsel %vm626_vm1, %v710_v41, 0.0 }
 0x60f   :  { %781 = vadd.xlane.f32.xlu0 %v746_v44  ;;  %783 = vadd.xlane.f32.xlu1 %v747_v45  ;;  %v670_v44 = vcombine.high %v668_v52, %v668_v52 }
 0x610   :  { %v530_v48 = vpop.permute.xlu0 %529  ;;  %v526_v49 = vpop.permute.xlu1 %525 }
 0x611   :  { %vm627_vm2 = vcmp.eq.f32.partialorder %v526_v49, %v1986_v15  ;;  %vm628_vm3 = vcmp.eq.f32.partialorder %v530_v48, %v1986_v15  ;;  %v698_v38 = vrot.slane %v670_v44, %v2090_v31  ;;  %v700_v31 = vcombine.high %v2234_v57, %v2234_v57 }
 0x612   :  { %v749_v51 = vsel %vm627_vm2, %v710_v41, 0.0  ;;  %v750_v40 = vsel %vm628_vm3, %v710_v41, 0.0 }
 0x613   :  { %785 = vadd.xlane.f32.xlu0 %v748_v50  ;;  %787 = vadd.xlane.f32.xlu1 %v749_v51 }
 0x614   :  { %v537_v54 = vpop.permute.xlu0 %536  ;;  %v533_v55 = vpop.permute.xlu1 %532 }
 0x615   :  { %vm629_vm12 = vcmp.eq.f32.partialorder %v533_v55, %v1986_v15  ;;  %vm630_vm4 = vcmp.eq.f32.partialorder %v537_v54, %v1986_v15 }
 0x616   :  { %v751_v56 = vsel %vm629_vm12, %v714_v53, 0.0  ;;  %v752_v32 = vsel %vm630_vm4, %v714_v53, 0.0 }
 0x617   :  { %789 = vadd.xlane.f32.xlu0 %v750_v40  ;;  %791 = vadd.xlane.f32.xlu1 %v751_v56  ;;  %v726_v40 = vrot.slane %v698_v38, %v2055_v6 }
 0x618   :  { %v545_v26 = vpop.permute.xlu0 %544  ;;  %v541_v27 = vpop.permute.xlu1 %540 }
 0x619   :  { %vm631_vm13 = vcmp.eq.f32.partialorder %v541_v27, %v1986_v15  ;;  %vm632_vm14 = vcmp.eq.f32.partialorder %v545_v26, %v1986_v15 }
 0x61a   :  { %v753_v33 = vsel %vm631_vm13, %v714_v53, 0.0  ;;  %v754_v36 = vsel %vm632_vm14, %v714_v53, 0.0 }
 0x61b   :  { %793 = vadd.xlane.f32.xlu0 %v752_v32  ;;  %795 = vadd.xlane.f32.xlu1 %v753_v33 }
 0x61c   :  { %v567_v35 = vpop.permute.xlu0 %566  ;;  %v563_v19 = vpop.permute.xlu1 %562 }
 0x61d   :  { %vm637_vm15 = vcmp.eq.f32.partialorder %v563_v19, %v1986_v15  ;;  %vm638_vm0 = vcmp.eq.f32.partialorder %v567_v35, %v1986_v15 }
 0x61e   :  { %v759_v28 = vsel %vm637_vm15, %v722_v34, 0.0  ;;  %v760_v42 = vsel %vm638_vm0, %v722_v34, 0.0 }
 0x61f   :  { %797 = vadd.xlane.f32.xlu0 %v754_v36  ;;  %807 = vadd.xlane.f32.xlu1 %v759_v28  ;;  %v730_v36 = vrot.slane %v700_v31, %v2055_v6  ;;  %v1917_v28 = vmov 0  }
 0x620   :  { %v575_v37 = vpop.permute.xlu0 %574  ;;  %v571_v41 = vpop.permute.xlu1 %570  ;;  %1690 = vset.pattern.permute.xlu0 %v1917_v28  ;;  %1689 = vset.pattern.permute.xlu1 %v1917_v28 }
 0x621   :  { %vm639_vm1 = vcmp.eq.f32.partialorder %v571_v41, %v1986_v15  ;;  %vm640_vm2 = vcmp.eq.f32.partialorder %v575_v37, %v1986_v15  ;;  %v702_v37 = vcombine.high %v698_v38, %v698_v38 }
 0x622   :  { %v761_v43 = vsel %vm639_vm1, %v722_v34, 0.0  ;;  %v762_v48 = vsel %vm640_vm2, %v722_v34, 0.0 }
 0x623   :  { %809 = vadd.xlane.f32.xlu0 %v760_v42  ;;  %811 = vadd.xlane.f32.xlu1 %v761_v43 }
 0x624   :  { %v552_v45 = vpop.permute.xlu0 %551  ;;  %v548_v46 = vpop.permute.xlu1 %547 }
 0x625   :  { %vm633_vm3 = vcmp.eq.f32.partialorder %v548_v46, %v1986_v15  ;;  %vm634_vm12 = vcmp.eq.f32.partialorder %v552_v45, %v1986_v15  ;;  %v734_v46 = vrot.slane %v702_v37, %v2055_v6 }
 0x626   :  { %v755_v49 = vsel %vm633_vm3, %v718_v47, 0.0  ;;  %v756_v53 = vsel %vm634_vm12, %v718_v47, 0.0 }
 0x627   :  { %813 = vadd.xlane.f32.xlu0 %v762_v48  ;;  %799 = vadd.xlane.f32.xlu1 %v755_v49 }
 0x628   :  { %v560_v50 = vpop.permute.xlu0 %559  ;;  %v556_v51 = vpop.permute.xlu1 %555 }
 0x629   :  { %vm635_vm4 = vcmp.eq.f32.partialorder %v556_v51, %v1986_v15  ;;  %vm636_vm13 = vcmp.eq.f32.partialorder %v560_v50, %v1986_v15 }
 0x62a   :  { %v757_v52 = vsel %vm635_vm4, %v718_v47, 0.0  ;;  %v758_v56 = vsel %vm636_vm13, %v718_v47, 0.0 }
 0x62b   :  { %801 = vadd.xlane.f32.xlu0 %v756_v53  ;;  %803 = vadd.xlane.f32.xlu1 %v757_v52  ;;  %v1167_v52 = vsub.s32 7, %v2044_v1 }
 0x62c   :  { %v582_v54 = vpop.permute.xlu0 %581  ;;  %v578_v55 = vpop.permute.xlu1 %577 }
 0x62d   :  { %vm641_vm14 = vcmp.eq.f32.partialorder %v578_v55, %v1986_v15  ;;  %vm642_vm15 = vcmp.eq.f32.partialorder %v582_v54, %v1986_v15  ;;  %v1168_v54 = vrot.slane %v2059_v7, %v1167_v52 }
 0x62e   :  { %v763_v26 = vsel %vm641_vm14, %v726_v40, 0.0  ;;  %v764_v33 = vsel %vm642_vm15, %v726_v40, 0.0 }
 0x62f   :  { %805 = vadd.xlane.f32.xlu0 %v758_v56  ;;  %815 = vadd.xlane.f32.xlu1 %v763_v26 }
 0x630   :  { %v590_v27 = vpop.permute.xlu0 %589  ;;  %v586_v32 = vpop.permute.xlu1 %585 }
 0x631   :  { %vm643_vm0 = vcmp.eq.f32.partialorder %v586_v32, %v1986_v15  ;;  %vm644_vm1 = vcmp.eq.f32.partialorder %v590_v27, %v1986_v15 }
 0x632   :  { %v765_v34 = vsel %vm643_vm0, %v726_v40, 0.0  ;;  %v766_v57 = vsel %vm644_vm1, %v726_v40, 0.0 }
 0x633   :  { %817 = vadd.xlane.f32.xlu0 %v764_v33  ;;  %819 = vadd.xlane.f32.xlu1 %v765_v34 }
 0x634   :  { %v597_v35 = vpop.permute.xlu0 %596  ;;  %v593_v19 = vpop.permute.xlu1 %592 }
 0x635   :  { %vm645_vm2 = vcmp.eq.f32.partialorder %v593_v19, %v1986_v15  ;;  %vm646_vm3 = vcmp.eq.f32.partialorder %v597_v35, %v1986_v15 }
 0x636   :  { %v767_v39 = vsel %vm645_vm2, %v730_v36, 0.0  ;;  %v768_v43 = vsel %vm646_vm3, %v730_v36, 0.0 }
 0x637   :  { %821 = vadd.xlane.f32.xlu0 %v766_v57  ;;  %823 = vadd.xlane.f32.xlu1 %v767_v39 }
 0x638   :  { %v605_v41 = vpop.permute.xlu0 %604  ;;  %v601_v42 = vpop.permute.xlu1 %600 }
 0x639   :  { %vm647_vm12 = vcmp.eq.f32.partialorder %v601_v42, %v1986_v15  ;;  %vm648_vm4 = vcmp.eq.f32.partialorder %v605_v41, %v1986_v15 }
 0x63a   :  { %v769_v44 = vsel %vm647_vm12, %v730_v36, 0.0  ;;  %v770_v49 = vsel %vm648_vm4, %v730_v36, 0.0 }
 0x63b   :  { %825 = vadd.xlane.f32.xlu0 %v768_v43  ;;  %827 = vadd.xlane.f32.xlu1 %v769_v44 }
 0x63c   :  { %v612_v45 = vpop.permute.xlu0 %611  ;;  %v608_v47 = vpop.permute.xlu1 %607 }
 0x63d   :  { %vm649_vm13 = vcmp.eq.f32.partialorder %v608_v47, %v1986_v15  ;;  %vm650_vm14 = vcmp.eq.f32.partialorder %v612_v45, %v1986_v15 }
 0x63e   :  { %v771_v48 = vsel %vm649_vm13, %v734_v46, 0.0  ;;  %v772_v53 = vsel %vm650_vm14, %v734_v46, 0.0 }
 0x63f   :  { %829 = vadd.xlane.f32.xlu0 %v770_v49  ;;  %831 = vadd.xlane.f32.xlu1 %v771_v48 }
 0x640   :  { %v620_v38 = vpop.permute.xlu0 %619  ;;  %v616_v50 = vpop.permute.xlu1 %615 }
 0x641   :  { %vm651_vm15 = vcmp.eq.f32.partialorder %v616_v50, %v1986_v15  ;;  %vm652_vm0 = vcmp.eq.f32.partialorder %v620_v38, %v1986_v15 }
 0x642   :  { %v773_v51 = vsel %vm651_vm15, %v734_v46, 0.0  ;;  %v774_v6 = vsel %vm652_vm0, %v734_v46, 0.0 }
 0x643   :  { %833 = vadd.xlane.f32.xlu0 %v772_v53  ;;  %835 = vadd.xlane.f32.xlu1 %v773_v51 }
 0x647   :  { %837 = vadd.xlane.f32.xlu0 %v774_v6 }
 0x654   :  { %1174 = vbcast.lane.b32.xlu1 %v1168_v54, 264 }
 0x658   :  { %1178 = vbcast.lane.b32.xlu1 %v1168_v54, 272 }
 0x65d   :  { %1170 = vbcast.lane.b32.xlu0 %v1168_v54, 256 }
 0x661   :  { %1163 = vbcast.lane.b32.xlu0 %v2075_v23, 280 }
 0x665   :  { %1182 = vbcast.lane.b32.xlu0 %v1168_v54, 280 }
 0x694   :  { %v778_v55 = vpop.xlane.xlu0 %777  ;;  %v776_v40 = vpop.xlane.xlu1 %775 }
 0x695   :  { %v1600_v56 = vmul.f32 -1.442695, %v778_v55  ;;  %v1599_v26 = vmul.f32 -1.442695, %v776_v40 }
 0x697   :  { %1715 = vpow2.f32 %v1600_v56 }
 0x698   :  { %1717 = vpow2.f32 %v1599_v26  ;;  %v780_v15 = vpop.xlane.xlu0 %779 }
 0x699   :  { %v1601_v31 = vmul.f32 -1.442695, %v780_v15 }
 0x69b   :  { %1719 = vpow2.f32 %v1601_v31 }
 0x69c   :  { %v782_v27 = vpop.xlane.xlu0 %781  ;;  %v784_v32 = vpop.xlane.xlu1 %783 }
 0x69d   :  { %v1602_v33 = vmul.f32 -1.442695, %v782_v27  ;;  %v1603_v34 = vmul.f32 -1.442695, %v784_v32 }
 0x69f   :  { %1721 = vpow2.f32 %v1602_v33 }
 0x6a0   :  { %1723 = vpow2.f32 %v1603_v34  ;;  %v786_v7 = vpop.xlane.xlu0 %785  ;;  %v788_v35 = vpop.xlane.xlu1 %787 }
 0x6a1   :  { %v1716_v19 = vpop.eup %1715  ;;  %v1604_v23 = vmul.f32 -1.442695, %v786_v7  ;;  %v1605_v57 = vmul.f32 -1.442695, %v788_v35 }
 0x6a2   :  { %v1718_v36 = vpop.eup %1717  ;;  %v936_v28 = vadd.f32 1.0, %v1716_v19 }
 0x6a3   :  { %v935_v39 = vadd.f32 1.0, %v1718_v36  ;;  %1725 = vpow2.f32 %v1604_v23 }
 0x6a4   :  { %1727 = vrcp.f32 %v936_v28  ;;  %v790_v37 = vpop.xlane.xlu0 %789  ;;  %v792_v41 = vpop.xlane.xlu1 %791 }
 0x6a5   :  { %v1720_v42 = vpop.eup %1719  ;;  %1729 = vrcp.f32 %v935_v39  ;;  %v1606_v43 = vmul.f32 -1.442695, %v790_v37  ;;  %v1607_v44 = vmul.f32 -1.442695, %v792_v41 }
 0x6a6   :  { %v937_v45 = vadd.f32 1.0, %v1720_v42  ;;  %1731 = vpow2.f32 %v1605_v57 }
 0x6a7   :  { %1733 = vpow2.f32 %v1606_v43 }
 0x6a8   :  { %1735 = vrcp.f32 %v937_v45  ;;  %v794_v46 = vpop.xlane.xlu0 %793  ;;  %v796_v47 = vpop.xlane.xlu1 %795 }
 0x6a9   :  { %v1722_v48 = vpop.eup %1721  ;;  %1737 = vpow2.f32 %v1607_v44  ;;  %v1608_v49 = vmul.f32 -1.442695, %v794_v46  ;;  %v1609_v51 = vmul.f32 -1.442695, %v796_v47 }
 0x6aa   :  { %v1724_v38 = vpop.eup %1723  ;;  %v938_v50 = vadd.f32 1.0, %v1722_v48 }
 0x6ab   :  { %v939_v53 = vadd.f32 1.0, %v1724_v38  ;;  %1739 = vpow2.f32 %v1608_v49 }
 0x6ac   :  { %1741 = vrcp.f32 %v938_v50  ;;  %v798_v6 = vpop.xlane.xlu0 %797  ;;  %v808_v52 = vpop.xlane.xlu1 %807 }
 0x6ad   :  { %v1726_v54 = vpop.eup %1725  ;;  %1743 = vrcp.f32 %v939_v53  ;;  %v1610_v55 = vmul.f32 -1.442695, %v798_v6  ;;  %v1615_v40 = vmul.f32 -1.442695, %v808_v52 }
 0x6ae   :  { %v1728_v56 = vpop.eup %1727  ;;  %v940_v26 = vadd.f32 1.0, %v1726_v54  ;;  %1745 = vpow2.f32 %v1609_v51 }
 0x6af   :  { %v1730_v15 = vpop.eup %1729  ;;  %1747 = vpow2.f32 %v1610_v55  ;;  %v1217_v31 = vmul.f32 %v1728_v56, %v2162_v61 }
 0x6b0   :  { %v1732_v27 = vpop.eup %1731  ;;  %1749 = vrcp.f32 %v940_v26  ;;  %v810_v32 = vpop.xlane.xlu0 %809  ;;  %v1216_v34 = vmul.f32 %v1730_v15, %v2156_v58 }
 0x6b1   :  { %v812_v33 = vpop.xlane.xlu1 %811  ;;  %v1734_v7 = vpop.eup %1733  ;;  %v941_v35 = vadd.f32 1.0, %v1732_v27  ;;  %1751 = vpow2.f32 %v1615_v40  ;;  %v1616_v19 = vmul.f32 -1.442695, %v810_v32  ;;  %1284 = vperm.xlu0 %1690, %v1217_v31  }
 0x6b2   :  { %v1736_v23 = vpop.eup %1735  ;;  %v942_v36 = vadd.f32 1.0, %v1734_v7  ;;  %1281 = vperm.xlu1 %1689, %v1216_v34   ;;  %v1617_v57 = vmul.f32 -1.442695, %v812_v33 }
 0x6b3   :  { %v1738_v28 = vpop.eup %1737  ;;  %1753 = vrcp.f32 %v941_v35  ;;  %v1218_v39 = vmul.f32 %v1736_v23, %v2158_v59 }
 0x6b4   :  { %1755 = vrcp.f32 %v942_v36  ;;  %v943_v61 = vadd.f32 1.0, %v1738_v28  ;;  %v814_v37 = vpop.xlane.xlu0 %813 }
 0x6b5   :  { %v800_v41 = vpop.xlane.xlu1 %799  ;;  %v1740_v42 = vpop.eup %1739  ;;  %1757 = vpow2.f32 %v1616_v19  ;;  %v1618_v58 = vmul.f32 -1.442695, %v814_v37 }
 0x6b6   :  { %v1742_v43 = vpop.eup %1741  ;;  %1759 = vrcp.f32 %v943_v61  ;;  %v944_v44 = vadd.f32 1.0, %v1740_v42  ;;  %v1611_v45 = vmul.f32 -1.442695, %v800_v41  ;;  %1287 = vperm.xlu1 %1689, %v1218_v39  }
 0x6b7   :  { %v1744_v46 = vpop.eup %1743  ;;  %1761 = vpow2.f32 %v1617_v57  ;;  %v1219_v47 = vmul.f32 %v1742_v43, %v2160_v60 }
 0x6b8   :  { %v1746_v48 = vpop.eup %1745  ;;  %1763 = vrcp.f32 %v944_v44  ;;  %v802_v49 = vpop.xlane.xlu0 %801  ;;  %v1220_v38 = vmul.f32 %v1744_v46, %v2164_v62 }
 0x6b9   :  { %v804_v59 = vpop.xlane.xlu1 %803  ;;  %v1748_v50 = vpop.eup %1747  ;;  %v945_v51 = vadd.f32 1.0, %v1746_v48  ;;  %1765 = vpow2.f32 %v1618_v58  ;;  %v1612_v53 = vmul.f32 -1.442695, %v802_v49 }
 0x6ba   :  { %v1750_v6 = vpop.eup %1749  ;;  %v946_v52 = vadd.f32 1.0, %v1748_v50  ;;  %1767 = vpow2.f32 %v1611_v45  ;;  %1290 = vperm.xlu1 %1689, %v1219_v47   ;;  %1293 = vperm.xlu0 %1690, %v1220_v38   ;;  %v1613_v55 = vmul.f32 -1.442695, %v804_v59 }
 0x6bb   :  { %v1752_v54 = vpop.eup %1751  ;;  %1769 = vrcp.f32 %v945_v51  ;;  %v1221_v60 = vmul.f32 %v1750_v6, %v2166_v63 }
 0x6bc   :  { %1771 = vrcp.f32 %v946_v52  ;;  %v951_v40 = vadd.f32 1.0, %v1752_v54  ;;  %v806_v56 = vpop.xlane.xlu0 %805 }
 0x6bd   :  { %v816_v26 = vpop.xlane.xlu1 %815  ;;  %v1754_v15 = vpop.eup %1753  ;;  %1773 = vpow2.f32 %v1612_v53  ;;  %v1614_v62 = vmul.f32 -1.442695, %v806_v56 }
 0x6be   :  { %v1619_v31 = vmul.f32 -1.442695, %v816_v26  ;;  %v1756_v27 = vpop.eup %1755  ;;  %1775 = vrcp.f32 %v951_v40  ;;  %1296 = vperm.xlu1 %1689, %v1221_v60   ;;  %v1222_v32 = vmul.f32 %v1754_v15, %v2168_v0 }
 0x6bf   :  { %v1758_v33 = vpop.eup %1757  ;;  %1777 = vpow2.f32 %v1613_v55  ;;  %v1223_v43 = vmul.f32 %v1756_v27, %v2170_v2 }
 0x6c0   :  { %v1760_v34 = vpop.eup %1759  ;;  %v952_v7 = vadd.f32 1.0, %v1758_v33  ;;  %1779 = vpow2.f32 %v1614_v62  ;;  %1299 = vperm.xlu0 %1690, %v1222_v32   ;;  %v818_v63 = vpop.xlane.xlu0 %817 }
 0x6c1   :  { %v820_v35 = vpop.xlane.xlu1 %819  ;;  %v1762_v19 = vpop.eup %1761  ;;  %1781 = vpow2.f32 %v1619_v31  ;;  %v1620_v23 = vmul.f32 -1.442695, %v818_v63  ;;  %v1224_v28 = vmul.f32 %v1760_v34, %v2172_v3 }
 0x6c2   :  { %v1621_v36 = vmul.f32 -1.442695, %v820_v35  ;;  %v1764_v57 = vpop.eup %1763  ;;  %1783 = vrcp.f32 %v952_v7  ;;  %v953_v39 = vadd.f32 1.0, %v1762_v19 }
 0x6c3   :  { %v1766_v61 = vpop.eup %1765  ;;  %1785 = vpow2.f32 %v1620_v23  ;;  %1305 = vperm.xlu1 %1689, %v1224_v28   ;;  %v1225_v0 = vmul.f32 %v1764_v57, %v2174_v4 }
 0x6c4   :  { %v1768_v37 = vpop.eup %1767  ;;  %1787 = vrcp.f32 %v953_v39  ;;  %v954_v41 = vadd.f32 1.0, %v1766_v61  ;;  %v822_v42 = vpop.xlane.xlu0 %821 }
 0x6c5   :  { %v824_v58 = vpop.xlane.xlu1 %823  ;;  %v1770_v44 = vpop.eup %1769  ;;  %v947_v45 = vadd.f32 1.0, %v1768_v37  ;;  %1789 = vpow2.f32 %v1621_v36  ;;  %v1622_v46 = vmul.f32 -1.442695, %v822_v42  ;;  %1308 = vperm.xlu0 %1690, %v1225_v0  }
 0x6c6   :  { %v1623_v3 = vmul.f32 -1.442695, %v824_v58  ;;  %v1772_v47 = vpop.eup %1771  ;;  %1791 = vrcp.f32 %v954_v41  ;;  %v1226_v49 = vmul.f32 %v1770_v44, %v2176_v5 }
 0x6c7   :  { %v1774_v48 = vpop.eup %1773  ;;  %1793 = vrcp.f32 %v947_v45  ;;  %1302 = vperm.xlu1 %1689, %v1223_v43   ;;  %v1227_v4 = vmul.f32 %v1772_v47, %v2178_v8 }
 0x6c8   :  { %v1776_v59 = vpop.eup %1775  ;;  %v948_v38 = vadd.f32 1.0, %v1774_v48  ;;  %1795 = vpow2.f32 %v1622_v46  ;;  %v826_v50 = vpop.xlane.xlu0 %825 }
 0x6c9   :  { %v828_v2 = vpop.xlane.xlu1 %827  ;;  %v1778_v51 = vpop.eup %1777  ;;  %1797 = vpow2.f32 %v1623_v3  ;;  %v1624_v53 = vmul.f32 -1.442695, %v826_v50  ;;  %1311 = vperm.xlu0 %1690, %v1226_v49   ;;  %v1232_v31 = vmul.f32 %v1776_v59, %v2188_v13 }
 0x6ca   :  { %v1780_v6 = vpop.eup %1779  ;;  %1799 = vrcp.f32 %v948_v38  ;;  %v949_v52 = vadd.f32 1.0, %v1778_v51  ;;  %v1625_v60 = vmul.f32 -1.442695, %v828_v2 }
 0x6cb   :  { %v1782_v54 = vpop.eup %1781  ;;  %v950_v55 = vadd.f32 1.0, %v1780_v6  ;;  %1801 = vpow2.f32 %v1624_v53  ;;  %1314 = vperm.xlu1 %1689, %v1227_v4  }
 0x6cc   :  { %v1784_v8 = vpop.eup %1783  ;;  %1803 = vrcp.f32 %v949_v52  ;;  %v955_v5 = vadd.f32 1.0, %v1782_v54  ;;  %v830_v40 = vpop.xlane.xlu0 %829 }
 0x6cd   :  { %v832_v56 = vpop.xlane.xlu1 %831  ;;  %v1786_v26 = vpop.eup %1785  ;;  %1805 = vrcp.f32 %v950_v55  ;;  %v1626_v15 = vmul.f32 -1.442695, %v830_v40  ;;  %v1233_v62 = vmul.f32 %v1784_v8, %v2190_v16 }
 0x6ce   :  { %v1788_v27 = vpop.eup %1787  ;;  %1807 = vrcp.f32 %v955_v5  ;;  %v956_v32 = vadd.f32 1.0, %v1786_v26  ;;  %v1627_v34 = vmul.f32 -1.442695, %v832_v56 }
 0x6cf   :  { %v1790_v33 = vpop.eup %1789  ;;  %1809 = vpow2.f32 %v1625_v60  ;;  %1332 = vperm.xlu0 %1690, %v1233_v62   ;;  %1329 = vperm.xlu1 %1689, %v1232_v31   ;;  %v1234_v13 = vmul.f32 %v1788_v27, %v2192_v17 }
 0x6d0   :  { %v1792_v7 = vpop.eup %1791  ;;  %1811 = vrcp.f32 %v956_v32  ;;  %v957_v63 = vadd.f32 1.0, %v1790_v33  ;;  %v834_v35 = vpop.xlane.xlu0 %833 }
 0x6d1   :  { %v836_v19 = vpop.xlane.xlu1 %835  ;;  %v1794_v23 = vpop.eup %1793  ;;  %1813 = vpow2.f32 %v1626_v15  ;;  %v1628_v36 = vmul.f32 -1.442695, %v834_v35  ;;  %v1235_v16 = vmul.f32 %v1792_v7, %v2198_v21 }
 0x6d2   :  { %v1796_v28 = vpop.eup %1795  ;;  %1815 = vrcp.f32 %v957_v63  ;;  %v1629_v61 = vmul.f32 -1.442695, %v836_v19  ;;  %v1228_v21 = vmul.f32 %v1794_v23, %v2180_v9 }
 0x6d3   :  { %v1798_v57 = vpop.eup %1797  ;;  %v958_v39 = vadd.f32 1.0, %v1796_v28  ;;  %1817 = vpow2.f32 %v1627_v34  ;;  %1338 = vperm.xlu1 %1689, %v1235_v16   ;;  %1335 = vperm.xlu0 %1690, %v1234_v13  }
 0x6d4   :  { %v1800_v0 = vpop.eup %1799  ;;  %v959_v37 = vadd.f32 1.0, %v1798_v57  ;;  %1819 = vpow2.f32 %v1628_v36  ;;  %v838_v41 = vpop.xlane.xlu0 %837 }
 0x6d5   :  { %v1802_v42 = vpop.eup %1801  ;;  %1821 = vrcp.f32 %v958_v39  ;;  %v1630_v58 = vmul.f32 -1.442695, %v838_v41  ;;  %v1229_v43 = vmul.f32 %v1800_v0, %v2182_v10  ;;  %v1175_v27 = vpop.permute.xlu1 %1174 }
 0x6d6   :  { %v1804_v17 = vpop.eup %1803  ;;  %1823 = vrcp.f32 %v959_v37  ;;  %v960_v44 = vadd.f32 1.0, %v1802_v42 }
 0x6d7   :  { %v1806_v45 = vpop.eup %1805  ;;  %1825 = vpow2.f32 %v1629_v61  ;;  %1320 = vperm.xlu0 %1690, %v1229_v43   ;;  %1317 = vperm.xlu1 %1689, %v1228_v21   ;;  %v1230_v48 = vmul.f32 %v1804_v17, %v2184_v11 }
 0x6d8   :  { %v1808_v46 = vpop.eup %1807  ;;  %1827 = vrcp.f32 %v960_v44  ;;  %v1231_v3 = vmul.f32 %v1806_v45, %v2186_v12  ;;  %v1171_v8 = vpop.permute.xlu0 %1170 }
 0x6d9   :  { %v1810_v47 = vpop.eup %1809  ;;  %1829 = vpow2.f32 %v1630_v58  ;;  %v1236_v2 = vmul.f32 %v1808_v46, %v2194_v18  ;;  %v1179_v7 = vpop.permute.xlu1 %1178 }
 0x6da   :  { %v1812_v4 = vpop.eup %1811  ;;  %v961_v49 = vadd.f32 1.0, %v1810_v47 }
 0x6db   :  { %v1814_v10 = vpop.eup %1813  ;;  %1326 = vperm.xlu1 %1689, %v1231_v3   ;;  %1323 = vperm.xlu0 %1690, %v1230_v48   ;;  %v1237_v9 = vmul.f32 %v1812_v4, %v2196_v20 }
 0x6dc   :  { %v1816_v59 = vpop.eup %1815  ;;  %1831 = vrcp.f32 %v961_v49  ;;  %v962_v38 = vadd.f32 1.0, %v1814_v10 }
 0x6dd   :  { %v1818_v50 = vpop.eup %1817  ;;  %v1238_v54 = vmul.f32 %v1816_v59, %v2200_v22  ;;  %v1164_v22 = vpop.permute.xlu0 %1163 }
 0x6de   :  { %v1820_v51 = vpop.eup %1819  ;;  %1833 = vrcp.f32 %v962_v38  ;;  %v963_v12 = vadd.f32 1.0, %v1818_v50 }
 0x6df   :  { %v1822_v53 = vpop.eup %1821  ;;  %v964_v6 = vadd.f32 1.0, %v1820_v51  ;;  %1344 = vperm.xlu0 %1690, %v1237_v9   ;;  %1341 = vperm.xlu1 %1689, %v1236_v2  }
 0x6e0   :  { %v1824_v11 = vpop.eup %1823  ;;  %1835 = vrcp.f32 %v963_v12  ;;  %v1239_v56 = vmul.f32 %v1822_v53, %v2209_v29 }
 0x6e1   :  { %v1826_v52 = vpop.eup %1825  ;;  %1837 = vrcp.f32 %v964_v6  ;;  %v1240_v20 = vmul.f32 %v1824_v11, %v2202_v24  ;;  %v1183_v63 = vpop.permute.xlu0 %1182 }
 0x6e2   :  { %v1828_v55 = vpop.eup %1827  ;;  %v965_v60 = vadd.f32 1.0, %v1826_v52 }
 0x6e3   :  { %v1830_v5 = vpop.eup %1829  ;;  %1347 = vperm.xlu0 %1690, %v1238_v54   ;;  %1353 = vperm.xlu1 %1689, %v1240_v20   ;;  %v1241_v18 = vmul.f32 %v1828_v55, %v2204_v25 }
 0x6e4   :  { %1839 = vrcp.f32 %v965_v60  ;;  %v966_v40 = vadd.f32 1.0, %v1830_v5 }
 0x6e6   :  { %v1832_v26 = vpop.eup %1831  ;;  %1841 = vrcp.f32 %v966_v40 }
 0x6e7   :  { %1356 = vperm.xlu0 %1690, %v1241_v18   ;;  %1350 = vperm.xlu1 %1689, %v1239_v56   ;;  %v1242_v24 = vmul.f32 %v1832_v26, %v2211_v30 }
 0x6e8   :  { %v1834_v15 = vpop.eup %1833 }
 0x6e9   :  { %v1243_v62 = vmul.f32 %v1834_v15, %v1164_v22 }
 0x6ea   :  { %v1836_v31 = vpop.eup %1835 }
 0x6eb   :  { %v1838_v32 = vpop.eup %1837  ;;  %1362 = vperm.xlu1 %1689, %v1243_v62   ;;  %1359 = vperm.xlu0 %1690, %v1242_v24   ;;  %v1244_v25 = vmul.f32 %v1836_v31, %v1171_v8 }
 0x6ec   :  { %v1245_v33 = vmul.f32 %v1838_v32, %v1175_v27 }
 0x6ee   :  { %v1840_v34 = vpop.eup %1839 }
 0x6ef   :  { %1365 = vperm.xlu1 %1689, %v1244_v25   ;;  %1368 = vperm.xlu0 %1690, %v1245_v33   ;;  %v1246_v35 = vmul.f32 %v1840_v34, %v1179_v7 }
 0x6f0   :  { %v1842_v29 = vpop.eup %1841 }
 0x6f1   :  { %v1247_v19 = vmul.f32 %v1842_v29, %v1183_v63 }
 0x6f3   :  { %1374 = vperm.xlu1 %1689, %v1247_v19   ;;  %1371 = vperm.xlu0 %1690, %v1246_v35  }
 0x6f4   :  { %1854 = shalt.err (!%p1851_p4)
}
 0x6f5   :  { %s1855_s28 = scalar_lea.hbm %s2445_s6, 128 }
 0x6f6   :  { %p1856_p5 = scmp.ne.s32.totalorder %s2445_s6, %s1855_s28  ;;  %p1859_p6 = scmp.lt.u32.totalorder %s1855_s28, %s2445_s6 }
 0x6f8   :  { %p1861_p7 = pnand %p1859_p6, %p1856_p5 }
 0x6fa   :  { %1864 = shalt.err (!%p1861_p7)
}
 0x6fb   :  { %1562 = dma.vmem_to_hbm [thread:$0]  %s1560_s22, 128, %s2445_s6, [#allocation5]  }
 0x6fc   :  { %s1865_s12 = scalar_lea.vmem %s1550_s24, 128  ;;  %p1870_p9 = scmp.lt.s32.totalorder %s1550_s24, %s1550_s24 }
 0x6fd   :  { %p1866_p8 = scmp.ne.s32.totalorder %s1550_s24, %s1865_s12  ;;  %p1871_p10 = scmp.lt.s32.totalorder %s1865_s12, %s1865_s12 }
 0x6ff   :  { %p1872_p11 = por %p1871_p10, %p1870_p9 }
 0x701   :  { %p1873_p12 = pnand %p1872_p11, %p1866_p8 }
 0x703   :  { %1876 = shalt.err (!%p1873_p12)
}
 0x704   :  { %s1877_s2 = scalar_lea.hbm %s2444_s5, 128 }
 0x705   :  { %p1878_p13 = scmp.ne.s32.totalorder %s2444_s5, %s1877_s2  ;;  %p1881_p0 = scmp.lt.u32.totalorder %s1877_s2, %s2444_s5 }
 0x707   :  { %p1883_p1 = pnand %p1881_p0, %p1878_p13 }
 0x709   :  { %1886 = shalt.err (!%p1883_p1)
}
 0x70a   :  { %1552 = dma.vmem_to_hbm [thread:$0]  %s1550_s24, 128, %s2444_s5, [#allocation3]   ;;  %v1380_v3 = vadd.s32 4294967288, %v1983_v14  ;;  %v1387_v47 = vadd.s32 4294967280, %v1983_v14  ;;  %v1394_v10 = vadd.s32 4294967272, %v1983_v14  ;;  %v2345_v9 = vsub.s32 %v1983_v14, %v2044_v1 }
 0x70b   :  { %vm1385_vm1 = vcmask 130112   ;;  %vm1392_vm2 = vcmask 195712   ;;  %vm1399_vm3 = vcmask 261312   ;;  %s1920_s5 = smov [#allocation6]  }
 0x70c   :  { %v2340_v49 = vsub.s32 %v1380_v3, %v2044_v1  ;;  %v2348_v59 = vsub.s32 %v1387_v47, %v2044_v1  ;;  %v2355_v12 = vsub.s32 %v1394_v10, %v2044_v1  ;;  %s1569_s18 = sshll.u32 %s1920_s5, 4  ;;  %s1570_s18 = int_to_ptr.vmem [resolvable:$true] %s1569_s18 }
 0x70d   :  { %s1887_s3 = scalar_lea.vmem %s1570_s18, 128  ;;  %p1892_p3 = scmp.lt.s32.totalorder %s1570_s18, %s1570_s18 }
 0x70e   :  { %p1888_p2 = scmp.ne.s32.totalorder %s1570_s18, %s1887_s3  ;;  %p1893_p4 = scmp.lt.s32.totalorder %s1887_s3, %s1887_s3 }
 0x710   :  { %p1894_p5 = por %p1893_p4, %p1892_p3 }
 0x712   :  { %p1895_p6 = pnand %p1894_p5, %p1888_p2 }
 0x730   :  { %v1285_v36 = vpop.permute.xlu0 %1284 }
 0x731   :  { %v1282_v30 = vpop.permute.xlu1 %1281  ;;  %v1384_v6 = vrot.slane %v1285_v36, %v2340_v49 }
 0x732   :  { %v1379_v14 = vrot.slane %v1282_v30, %v2345_v9 }
 0x734   :  { %v1386_v15 = vsel %vm1385_vm1, %v1384_v6, %v1379_v14 }
 0x735   :  { %v1288_v23 = vpop.permute.xlu1 %1287 }
 0x736   :  { %v1391_v54 = vrot.slane %v1288_v23, %v2348_v59 }
 0x738   :  { %v1393_v31 = vsel %vm1392_vm2, %v1391_v54, %v1386_v15 }
 0x739   :  { %v2323_v16 = vpop.permute.xlu1 %1290  ;;  %v1294_v13 = vpop.permute.xlu0 %1293 }
 0x73a   :  { %v1404_v51 = vrot.slane %v1294_v13, %v2345_v9  ;;  %v1398_v22 = vrot.slane %v2323_v16, %v2355_v12 }
 0x73c   :  { %v1400_v23 = vsel %vm1399_vm3, %v1398_v22, %v1393_v31 }
 0x73d   :  { %v1297_v28 = vpop.permute.xlu1 %1296 }
 0x73e   :  { %v1408_v38 = vrot.slane %v1297_v28, %v2340_v49 }
 0x73f   :  { %v1300_v57 = vpop.permute.xlu0 %1299 }
 0x740   :  { %v1413_v11 = vrot.slane %v1300_v57, %v2348_v59  ;;  %v1409_v20 = vsel %vm1385_vm1, %v1408_v38, %v1404_v51 }
 0x742   :  { %v1306_v39 = vpop.permute.xlu1 %1305  ;;  %v1414_v62 = vsel %vm1392_vm2, %v1413_v11, %v1409_v20 }
 0x743   :  { %v1423_v55 = vrot.slane %v1306_v39, %v2345_v9 }
 0x744   :  { %v1309_v61 = vpop.permute.xlu0 %1308 }
 0x745   :  { %v1427_v53 = vrot.slane %v1309_v61, %v2340_v49 }
 0x746   :  { %v1303_v0 = vpop.permute.xlu1 %1302 }
 0x747   :  { %v1418_v60 = vrot.slane %v1303_v0, %v2355_v12  ;;  %v1428_v40 = vsel %vm1385_vm1, %v1427_v53, %v1423_v55 }
 0x748   :  { %v1312_v37 = vpop.permute.xlu0 %1311 }
 0x749   :  { %v1432_v52 = vrot.slane %v1312_v37, %v2348_v59  ;;  %v1419_v27 = vsel %vm1399_vm3, %v1418_v60, %v1414_v62 }
 0x74a   :  { %v1315_v41 = vpop.permute.xlu1 %1314  ;;  %v1534_v28 = vsel %vm407_vm5, %v1419_v27, %v1400_v23  ;;  %vm2470_vm5 = vcmask 261120  }
 0x74b   :  { %v1437_v56 = vrot.slane %v1315_v41, %v2355_v12  ;;  %v1433_v24 = vsel %vm1392_vm2, %v1432_v52, %v1428_v40 }
 0x74d   :  { %v1438_v63 = vsel %vm1399_vm3, %v1437_v56, %v1433_v24 }
 0x74e   :  { %v2325_v42 = vpop.permute.xlu0 %1332  ;;  %v2327_v58 = vpop.permute.xlu1 %1329  ;;  %v1535_v61 = vsel %vm409_vm6, %v1438_v63, %v1534_v28 }
 0x74f   :  { %v1465_v32 = vrot.slane %v2325_v42, %v2340_v49  ;;  %v1461_v33 = vrot.slane %v2327_v58, %v2345_v9 }
 0x751   :  { %v1466_v0 = vsel %vm1385_vm1, %v1465_v32, %v1461_v33 }
 0x752   :  { %v2329_v43 = vpop.permute.xlu0 %1335  ;;  %v2331_v21 = vpop.permute.xlu1 %1338 }
 0x753   :  { %v1470_v35 = vrot.slane %v2329_v43, %v2348_v59 }
 0x755   :  { %v1471_v43 = vsel %vm1392_vm2, %v1470_v35, %v1466_v0 }
 0x756   :  { %v1321_v17 = vpop.permute.xlu0 %1320  ;;  %v1318_v44 = vpop.permute.xlu1 %1317 }
 0x757   :  { %v1446_v1 = vrot.slane %v1321_v17, %v2340_v49  ;;  %v1442_v8 = vrot.slane %v1318_v44, %v2345_v9  ;;  %v1475_v17 = vrot.slane %v2331_v21, %v2355_v12 }
 0x759   :  { %v1447_v25 = vsel %vm1385_vm1, %v1446_v1, %v1442_v8 }
 0x75a   :  { %v1324_v45 = vpop.permute.xlu0 %1323  ;;  %v1327_v46 = vpop.permute.xlu1 %1326 }
 0x75b   :  { %v1451_v26 = vrot.slane %v1324_v45, %v2348_v59  ;;  %v1456_v34 = vrot.slane %v1327_v46, %v2355_v12 }
 0x75d   :  { %v1452_v19 = vsel %vm1392_vm2, %v1451_v26, %v1447_v25 }
 0x75e   :  { %v2335_v48 = vpop.permute.xlu0 %1344  ;;  %v2337_v4 = vpop.permute.xlu1 %1341  ;;  %v1457_v37 = vsel %vm1399_vm3, %v1456_v34, %v1452_v19 }
 0x75f   :  { %v1484_v36 = vrot.slane %v2335_v48, %v2340_v49  ;;  %v1480_v16 = vrot.slane %v2337_v4, %v2345_v9  ;;  %v1536_v4 = vsel %vm411_vm7, %v1457_v37, %v1535_v61 }
 0x761   :  { %v1485_v46 = vsel %vm1385_vm1, %v1484_v36, %v1480_v16 }
 0x762   :  { %v2351_v50 = vpop.permute.xlu0 %1347  ;;  %v1354_v2 = vpop.permute.xlu1 %1353 }
 0x763   :  { %v1489_v57 = vrot.slane %v2351_v50, %v2348_v59  ;;  %v1499_v39 = vrot.slane %v1354_v2, %v2345_v9  ;;  %v1476_v2 = vsel %vm1399_vm3, %v1475_v17, %v1471_v43 }
 0x765   :  { %v1490_v10 = vsel %vm1392_vm2, %v1489_v57, %v1485_v46 }
 0x766   :  { %v1357_v5 = vpop.permute.xlu0 %1356  ;;  %v1351_v18 = vpop.permute.xlu1 %1350 }
 0x767   :  { %v1503_v30 = vrot.slane %v1357_v5, %v2340_v49  ;;  %v1494_v41 = vrot.slane %v1351_v18, %v2355_v12 }
 0x769   :  { %v1504_v44 = vsel %vm1385_vm1, %v1503_v30, %v1499_v39  ;;  %v1495_v38 = vsel %vm1399_vm3, %v1494_v41, %v1490_v10 }
 0x76a   :  { %v1360_v29 = vpop.permute.xlu0 %1359  ;;  %v1363_v7 = vpop.permute.xlu1 %1362 }
 0x76b   :  { %v1508_v13 = vrot.slane %v1360_v29, %v2348_v59  ;;  %v1513_v45 = vrot.slane %v1363_v7, %v2355_v12 }
 0x76d   :  { %v1509_v3 = vsel %vm1392_vm2, %v1508_v13, %v1504_v44 }
 0x76e   :  { %v1369_v42 = vpop.permute.xlu0 %1368  ;;  %v1366_v58 = vpop.permute.xlu1 %1365  ;;  %v1514_v51 = vsel %vm1399_vm3, %v1513_v45, %v1509_v3 }
 0x76f   :  { %v1522_v47 = vrot.slane %v1369_v42, %v2340_v49  ;;  %v1518_v48 = vrot.slane %v1366_v58, %v2345_v9  ;;  %v1537_v9 = vsel %vm413_vm8, %v1476_v2, %v1536_v4 }
 0x770   :  { %v1538_v11 = vsel %vm415_vm9, %v1495_v38, %v1537_v9 }
 0x771   :  { %v1523_v49 = vsel %vm1385_vm1, %v1522_v47, %v1518_v48  ;;  %v1539_v54 = vsel %vm417_vm10, %v1514_v51, %v1538_v11 }
 0x772   :  { %v1372_v50 = vpop.permute.xlu0 %1371  ;;  %v1375_v21 = vpop.permute.xlu1 %1374 }
 0x773   :  { %v1527_v53 = vrot.slane %v1372_v50, %v2348_v59  ;;  %v1532_v6 = vrot.slane %v1375_v21, %v2355_v12 }
 0x775   :  { %v1528_v14 = vsel %vm1392_vm2, %v1527_v53, %v1523_v49 }
 0x776   :  { %v1533_v52 = vsel %vm1399_vm3, %v1532_v6, %v1528_v14 }
 0x777   :  { %v1540_v20 = vsel %vm419_vm11, %v1533_v52, %v1539_v54 }
 0x778   :  { %1542 = vst.msk [vmem:[#allocation6] sm:$0xff] %vm2470_vm5, %v1540_v20 }
 0x779   :  { %1898 = shalt.err (!%p1895_p6)
}
 0x77a   :  { %s1899_s21 = scalar_lea.hbm %s2446_s7, 128 }
 0x77b   :  { %p1900_p7 = scmp.ne.s32.totalorder %s2446_s7, %s1899_s21  ;;  %p1903_p8 = scmp.lt.u32.totalorder %s1899_s21, %s2446_s7 }
 0x77d   :  { %p1905_p9 = pnand %p1903_p8, %p1900_p7 }
 0x77f   :  { %1908 = shalt.err (!%p1905_p9)
}
 0x780   :  { %1572 = dma.vmem_to_hbm [thread:$0]  %s1570_s18, 128, %s2446_s7, [#allocation5]  }
 0x781   :  { %1909 = dma.done.wait [#allocation3], 128  }
 0x782   :  { %1910 = vsyncadd [#allocation3], 4294967168 }
 0x783   :  { %1911 = dma.done.wait [#allocation5], 256  }
 0x784   :  { %1912 = vsyncadd [#allocation5], 4294967040 }
 0x785   :  { %1582 = vsyncpa [#allocation3], 1 }
 0x786   :  { %1583 = vsyncpa [#allocation5], 1 }

</bundles_post_ra>
